<compile_context>
chip_gen: v6e
topology: v6e:2x2x1
jax: 0.10.0
libtpu: 0.0.40
codegen_flags: <defaults>
</compile_context>

<pallas_src>
import functools

import numpy as np

import jax
import jax.numpy as jnp
from jax import lax
from jax.experimental import pallas as pl
from jax.experimental.pallas import tpu as pltpu


# ---------------------------------------------------------------------------
# Geometry of the flattened-spatial representation (all Python ints)
# ---------------------------------------------------------------------------
def _geometry(H):
    # Stage A: ConvTranspose2d(Cd, h1, 2)  == pad(1) + 2x2 valid conv
    SA = H + 2                       # row stride of padded latent (== padded W)
    HoB = H                          # spatial after stage B (layer1 conv)
    NposB = (HoB - 1) * SA + HoB     # columns of OB we must compute
    NposA = (SA + 1) + NposB         # columns of OA stage B needs
    LA = (SA + 1) + NposA            # == (H+2)^2, padded latent flat length
    # Stage C: upsample 2x -> pad(1) -> 3x3 conv
    HoC = 2 * HoB
    SC = HoC + 2
    NposC = (HoC - 1) * SC + HoC
    LC = SC * SC
    # Stage D: upsample 2x -> pad(1) -> 3x3 conv
    HoD = 2 * HoC
    SD = HoD + 2
    NposD = (HoD - 1) * SD + HoD
    LD = SD * SD
    assert LA == (H + 2) * (H + 2)
    assert 2 * SC + 2 + NposC == LC and 2 * SD + 2 + NposD == LD
    return dict(SA=SA, HoB=HoB, NposB=NposB, NposA=NposA, LA=LA,
                SC=SC, HoC=HoC, NposC=NposC, LC=LC,
                SD=SD, HoD=HoD, NposD=NposD, LD=LD)


def _upsample_pad_matrix(src_rows, src_stride, dst_stride, k_src, n_dst):
    """Constant 0/1 matrix: (valid src_rows x src_rows map, row stride
    src_stride) -> nearest-2x upsampled, zero-padded(+1) map flattened with
    row stride dst_stride.  Applied as one matmul inside the kernel."""
    u = np.zeros((k_src, n_dst), np.float32)
    up = 2 * src_rows
    for a in range(1, up + 1):
        for b in range(1, up + 1):
            q = a * dst_stride + b
            p = ((a - 1) // 2) * src_stride + ((b - 1) // 2)
            u[p, q] = 1.0
    return u


# ---------------------------------------------------------------------------
# The fused decoder kernel (runs once per image; grid = (N,))
# ---------------------------------------------------------------------------
def _decoder_kernel(zp_ref, wA_ref, bA_ref, wB_ref, bB_ref, wC_ref, bC_ref,
                    wD_ref, bD_ref, u1_ref, u2_ref, out_ref, *,
                    SA, NposA, NposB, SC, NposC, SD, NposD, WoD):
    f32 = jnp.float32
    h1 = wA_ref.shape[1]
    h0 = wB_ref.shape[1]

    # zero-padded, row-flattened latent: (Cd, (H+2)^2), spatial on lanes
    pa = zp_ref[...]

    # ---- layerLatent: ConvTranspose2d(Cd, h1, 2) -> 2x2 valid conv + ReLU --
    acc = jnp.broadcast_to(bA_ref[...], (h1, NposA))
    for i in range(2):
        for j in range(2):
            off = i * SA + j
            acc = acc + jnp.dot(wA_ref[i * 2 + j],
                                pa[:, off:off + NposA],
                                preferred_element_type=f32)
    oa = jnp.maximum(acc, 0.0)                                   # (h1, NposA)

    # ---- layer1: ConvTranspose2d(h1, h0, 2, pad=1) -> 2x2 valid conv + ReLU
    acc = jnp.broadcast_to(bB_ref[...], (h0, NposB))
    for i in range(2):
        for j in range(2):
            off = i * SA + j
            acc = acc + jnp.dot(wB_ref[i * 2 + j],
                                oa[:, off:off + NposB],
                                preferred_element_type=f32)
    ob = jnp.maximum(acc, 0.0)                                   # (h0, NposB)

    # ---- fused nearest-2x upsample + zero pad(1) + restride: one matmul ----
    pc = jnp.dot(ob, u1_ref[...], preferred_element_type=f32)    # (h0, SC*SC)

    # ---- layerOut conv #1: Conv2d(h0, 1, 3, pad=1) --------------------------
    acc = jnp.broadcast_to(bC_ref[...], (1, NposC))
    for i in range(3):
        for j in range(3):
            off = i * SC + j
            acc = acc + jnp.dot(wC_ref[i * 3 + j],
                                pc[:, off:off + NposC],
                                preferred_element_type=f32)
    oc = acc                                                     # (1, NposC)

    # ---- fused nearest-2x upsample + zero pad(1) + restride: one matmul ----
    pd = jnp.dot(oc, u2_ref[...], preferred_element_type=f32)    # (1, SD*SD)

    # ---- layerOut conv #2: Conv2d(1, 1, 3, pad=1) + Sigmoid -----------------
    acc = jnp.broadcast_to(bD_ref[...], (1, NposD))
    for i in range(3):
        for j in range(3):
            off = i * SD + j
            acc = acc + wD_ref[i * 3 + j] * pd[:, off:off + NposD]
    od = jax.nn.sigmoid(acc)                                     # (1, NposD)

    # ---- compact stride-SD rows into the dense (1, WoD*WoD) output ----------
    for r in range(WoD):
        out_ref[:, r * WoD:(r + 1) * WoD] = od[:, r * SD:r * SD + WoD]


# ---------------------------------------------------------------------------
# Public wrapper: NCHW latent in, NCHW image out (matches the PyTorch module)
# ---------------------------------------------------------------------------
def decoder_forward(z, params):
    N, Cd, H, W = z.shape
    assert H == W
    h1 = params["wL"].shape[1]
    h0 = params["w1"].shape[1]
    g = _geometry(H)
    f32 = jnp.float32

    # Weight re-layout (tiny, one-time XLA ops).  ConvTranspose2d ->
    # forward-conv weights: flip spatially, swap in/out channels.
    wA = jnp.transpose(jnp.flip(params["wL"].astype(f32), (2, 3)),
                       (2, 3, 1, 0)).reshape(4, h1, Cd)
    bA = params["bL"].astype(f32).reshape(h1, 1)
    wB = jnp.transpose(jnp.flip(params["w1"].astype(f32), (2, 3)),
                       (2, 3, 1, 0)).reshape(4, h0, h1)
    bB = params["b1"].astype(f32).reshape(h0, 1)
    wC = jnp.transpose(params["wO1"].astype(f32), (2, 3, 0, 1)).reshape(9, 1, h0)
    bC = params["bO1"].astype(f32).reshape(1, 1)
    wD = jnp.transpose(params["wO2"].astype(f32), (2, 3, 0, 1)).reshape(9, 1, 1)
    bD = params["bO2"].astype(f32).reshape(1, 1)

    # Constant upsample(+pad+restride) selection matrices (trace-time numpy).
    u1 = _upsample_pad_matrix(g["HoB"], g["SA"], g["SC"], g["NposB"], g["LC"])
    u2 = _upsample_pad_matrix(g["HoC"], g["SC"], g["SD"], g["NposC"], g["LD"])

    # Zero-pad the latent by 1 and flatten spatial (NCHW is already (C, H, W),
    # so channels land on sublanes and flat spatial on lanes -- no transpose).
    z_pad = jnp.pad(z.astype(f32), ((0, 0), (0, 0), (1, 1), (1, 1)))
    z_flat = z_pad.reshape(N, Cd, g["LA"])

    kernel = functools.partial(
        _decoder_kernel,
        SA=g["SA"], NposA=g["NposA"], NposB=g["NposB"],
        SC=g["SC"], NposC=g["NposC"],
        SD=g["SD"], NposD=g["NposD"], WoD=g["HoD"])

    out = pl.pallas_call(
        kernel,
        out_shape=jax.ShapeDtypeStruct((N, 1, g["HoD"] * g["HoD"]), f32),
        grid_spec=pltpu.PrefetchScalarGridSpec(
            num_scalar_prefetch=0,
            grid=(N,),
            in_specs=[
                pl.BlockSpec((None, Cd, g["LA"]), lambda n: (n, 0, 0)),
                pl.BlockSpec((4, h1, Cd), lambda n: (0, 0, 0)),
                pl.BlockSpec((h1, 1), lambda n: (0, 0)),
                pl.BlockSpec((4, h0, h1), lambda n: (0, 0, 0)),
                pl.BlockSpec((h0, 1), lambda n: (0, 0)),
                pl.BlockSpec((9, 1, h0), lambda n: (0, 0, 0)),
                pl.BlockSpec((1, 1), lambda n: (0, 0)),
                pl.BlockSpec((9, 1, 1), lambda n: (0, 0, 0)),
                pl.BlockSpec((1, 1), lambda n: (0, 0)),
                pl.BlockSpec((g["NposB"], g["LC"]), lambda n: (0, 0)),
                pl.BlockSpec((g["NposC"], g["LD"]), lambda n: (0, 0)),
            ],
            out_specs=pl.BlockSpec((None, 1, g["HoD"] * g["HoD"]),
                                   lambda n: (n, 0, 0)),
        ),
        compiler_params=pltpu.CompilerParams(
            dimension_semantics=("parallel",)),
    )(z_flat, wA, bA, wB, bB, wC, bC, wD, bD, u1, u2)

    return out.reshape(N, 1, g["HoD"], g["HoD"])


# ---------------------------------------------------------------------------
# Pure-XLA reference (used only to validate the Pallas kernel numerically)
# ---------------------------------------------------------------------------
def _ref_forward(z, params):
    f32 = jnp.float32

    def conv(x, w_oihw, b, pad):
        y = lax.conv_general_dilated(
            x.astype(f32), w_oihw.astype(f32), (1, 1),
            [(pad, pad), (pad, pad)],
            dimension_numbers=("NCHW", "OIHW", "NCHW"))
        return y + b.reshape(1, -1, 1, 1)

    def convT(x, w_iohw, b, pad):
        k = w_iohw.shape[2]
        w = jnp.transpose(jnp.flip(w_iohw, (2, 3)), (1, 0, 2, 3))
        return conv(x, w, b, k - 1 - pad)

    def up2(x):
        return jnp.repeat(jnp.repeat(x, 2, axis=2), 2, axis=3)

    x = jnp.maximum(convT(z, params["wL"], params["bL"], 0), 0.0)
    x = jnp.maximum(convT(x, params["w1"], params["b1"], 1), 0.0)
    x = up2(x)
    x = conv(x, params["wO1"], params["bO1"], 1)
    x = up2(x)
    x = jax.nn.sigmoid(conv(x, params["wO2"], params["bO2"], 1))
    return x


# ---------------------------------------------------------------------------
# Deterministic parameter init (shapes follow the module's __init__)
# ---------------------------------------------------------------------------
def init_params(key, compressed_dim, hidden_dims):
    h0, h1 = hidden_dims[0], hidden_dims[1]
    ks = jax.random.split(key, 8)

    def u(k, shape, fan_in):
        bound = 1.0 / jnp.sqrt(jnp.float32(fan_in))
        return jax.random.uniform(k, shape, jnp.float32, -bound, bound)

    return {
        # ConvTranspose2d(compressed_dim, h1, 2): weight (Cin, Cout, 2, 2)
        "wL": u(ks[0], (compressed_dim, h1, 2, 2), compressed_dim * 4),
        "bL": u(ks[1], (h1,), compressed_dim * 4),
        # ConvTranspose2d(h1, h0, 2, padding=1)
        "w1": u(ks[2], (h1, h0, 2, 2), h1 * 4),
        "b1": u(ks[3], (h0,), h1 * 4),
        # Conv2d(h0, 1, 3, padding=1): weight (Cout, Cin, 3, 3)
        "wO1": u(ks[4], (1, h0, 3, 3), h0 * 9),
        "bO1": u(ks[5], (1,), h0 * 9),
        # Conv2d(1, 1, 3, padding=1)
        "wO2": u(ks[6], (1, 1, 3, 3), 9),
        "bO2": u(ks[7], (1,), 9),
    }


if __name__ == "__main__":
    compressed_dim = 8
    hidden_dims = [16, 32]     # [h0, h1]
    N, H = 2, 4                # latent z: (N, compressed_dim, H, H)

    key = jax.random.PRNGKey(0)
    kz, kp = jax.random.split(key)
    z = jax.random.normal(kz, (N, compressed_dim, H, H), jnp.float32)
    params = init_params(kp, compressed_dim, hidden_dims)

    fwd = jax.jit(decoder_forward)
    out = jax.block_until_ready(fwd(z, params))

    # Shape check: H -> H+1 -> H -> 2H -> 2H -> 4H -> 4H
    assert out.shape == (N, 1, 4 * H, 4 * H), out.shape

    # Numerical check of the fused Pallas decoder against the XLA reference.
    ref = jax.block_until_ready(_ref_forward(z, params))
    err = float(jnp.max(jnp.abs(out - ref)))
    assert err < 1e-4, err

    print("KERNEL_OK")
</pallas_src>

<mosaic_0001>
module attributes {stable_mosaic.version = 11 : i64} {
  func.func @_decoder_kernel(%arg0: i32, %arg1: memref<1x8x36xf32, #tpu.memory_space<vmem>>, %arg2: memref<4x32x8xf32, #tpu.memory_space<vmem>>, %arg3: memref<32x1xf32, #tpu.memory_space<vmem>>, %arg4: memref<4x16x32xf32, #tpu.memory_space<vmem>>, %arg5: memref<16x1xf32, #tpu.memory_space<vmem>>, %arg6: memref<9x1x16xf32, #tpu.memory_space<vmem>>, %arg7: memref<1x1xf32, #tpu.memory_space<vmem>>, %arg8: memref<9x1x1xf32, #tpu.memory_space<vmem>>, %arg9: memref<1x1xf32, #tpu.memory_space<vmem>>, %arg10: memref<22x100xf32, #tpu.memory_space<vmem>>, %arg11: memref<78x324xf32, #tpu.memory_space<vmem>>, %arg12: memref<1x1x256xf32, #tpu.memory_space<vmem>>) attributes {dimension_semantics = [#tpu.dimension_semantics<parallel>], iteration_bounds = array<i64: 2>, scalar_prefetch = 0 : i64, scratch_operands = 0 : i64, tpu.core_type = #tpu.core_type<tc>, window_params = [{transform_indices = @transform_0, window_bounds = array<i64: 1, 8, 36>}, {pipeline_mode = #tpu.pipeline_mode<synchronous>, transform_indices = @transform_1, window_bounds = array<i64: 4, 32, 8>}, {pipeline_mode = #tpu.pipeline_mode<synchronous>, transform_indices = @transform_2, window_bounds = array<i64: 32, 1>}, {pipeline_mode = #tpu.pipeline_mode<synchronous>, transform_indices = @transform_3, window_bounds = array<i64: 4, 16, 32>}, {pipeline_mode = #tpu.pipeline_mode<synchronous>, transform_indices = @transform_4, window_bounds = array<i64: 16, 1>}, {pipeline_mode = #tpu.pipeline_mode<synchronous>, transform_indices = @transform_5, window_bounds = array<i64: 9, 1, 16>}, {pipeline_mode = #tpu.pipeline_mode<synchronous>, transform_indices = @transform_6, window_bounds = array<i64: 1, 1>}, {pipeline_mode = #tpu.pipeline_mode<synchronous>, transform_indices = @transform_7, window_bounds = array<i64: 9, 1, 1>}, {pipeline_mode = #tpu.pipeline_mode<synchronous>, transform_indices = @transform_8, window_bounds = array<i64: 1, 1>}, {pipeline_mode = #tpu.pipeline_mode<synchronous>, transform_indices = @transform_9, window_bounds = array<i64: 22, 100>}, {pipeline_mode = #tpu.pipeline_mode<synchronous>, transform_indices = @transform_10, window_bounds = array<i64: 78, 324>}, {transform_indices = @transform_11, window_bounds = array<i64: 1, 1, 256>}]} {
    %c0 = arith.constant 0 : index
    %c0_0 = arith.constant 0 : index
    %c0_1 = arith.constant 0 : index
    %0 = vector.load %arg1[%c0, %c0_0, %c0_1] : memref<1x8x36xf32, #tpu.memory_space<vmem>>, vector<1x8x36xf32>
    %1 = vector.shape_cast %0 : vector<1x8x36xf32> to vector<8x36xf32>
    %c0_2 = arith.constant 0 : index
    %c0_3 = arith.constant 0 : index
    %2 = vector.load %arg3[%c0_2, %c0_3] : memref<32x1xf32, #tpu.memory_space<vmem>>, vector<32x1xf32>
    %3 = vector.shape_cast %2 : vector<32x1xf32> to vector<32x1xf32>
    %4 = vector.broadcast %3 : vector<32x1xf32> to vector<32x29xf32>
    %c0_4 = arith.constant 0 : index
    %c0_5 = arith.constant 0 : index
    %c0_6 = arith.constant 0 : index
    %5 = vector.load %arg2[%c0_4, %c0_5, %c0_6] : memref<4x32x8xf32, #tpu.memory_space<vmem>>, vector<1x32x8xf32>
    %6 = vector.shape_cast %5 : vector<1x32x8xf32> to vector<32x8xf32>
    %7 = vector.extract_strided_slice %1 {offsets = [0, 0], sizes = [8, 29], strides = [1, 1]} : vector<8x36xf32> to vector<8x29xf32>
    %cst = arith.constant dense<0.000000e+00> : vector<32x29xf32>
    %8 = tpu.matmul %6, %7, %cst {dimension_numbers = #tpu.dot_dimension_numbers<[1], [0], [0], [1], [0, 0, 1, 1], [], []>} : vector<32x8xf32>, vector<8x29xf32>, vector<32x29xf32> -> vector<32x29xf32>
    %9 = arith.addf %4, %8 : vector<32x29xf32>
    %c1 = arith.constant 1 : index
    %c0_7 = arith.constant 0 : index
    %c0_8 = arith.constant 0 : index
    %10 = vector.load %arg2[%c1, %c0_7, %c0_8] : memref<4x32x8xf32, #tpu.memory_space<vmem>>, vector<1x32x8xf32>
    %11 = vector.shape_cast %10 : vector<1x32x8xf32> to vector<32x8xf32>
    %12 = vector.extract_strided_slice %1 {offsets = [0, 1], sizes = [8, 29], strides = [1, 1]} : vector<8x36xf32> to vector<8x29xf32>
    %cst_9 = arith.constant dense<0.000000e+00> : vector<32x29xf32>
    %13 = tpu.matmul %11, %12, %cst_9 {dimension_numbers = #tpu.dot_dimension_numbers<[1], [0], [0], [1], [0, 0, 1, 1], [], []>} : vector<32x8xf32>, vector<8x29xf32>, vector<32x29xf32> -> vector<32x29xf32>
    %14 = arith.addf %9, %13 : vector<32x29xf32>
    %c2 = arith.constant 2 : index
    %c0_10 = arith.constant 0 : index
    %c0_11 = arith.constant 0 : index
    %15 = vector.load %arg2[%c2, %c0_10, %c0_11] : memref<4x32x8xf32, #tpu.memory_space<vmem>>, vector<1x32x8xf32>
    %16 = vector.shape_cast %15 : vector<1x32x8xf32> to vector<32x8xf32>
    %17 = vector.extract_strided_slice %1 {offsets = [0, 6], sizes = [8, 29], strides = [1, 1]} : vector<8x36xf32> to vector<8x29xf32>
    %cst_12 = arith.constant dense<0.000000e+00> : vector<32x29xf32>
    %18 = tpu.matmul %16, %17, %cst_12 {dimension_numbers = #tpu.dot_dimension_numbers<[1], [0], [0], [1], [0, 0, 1, 1], [], []>} : vector<32x8xf32>, vector<8x29xf32>, vector<32x29xf32> -> vector<32x29xf32>
    %19 = arith.addf %14, %18 : vector<32x29xf32>
    %c3 = arith.constant 3 : index
    %c0_13 = arith.constant 0 : index
    %c0_14 = arith.constant 0 : index
    %20 = vector.load %arg2[%c3, %c0_13, %c0_14] : memref<4x32x8xf32, #tpu.memory_space<vmem>>, vector<1x32x8xf32>
    %21 = vector.shape_cast %20 : vector<1x32x8xf32> to vector<32x8xf32>
    %22 = vector.extract_strided_slice %1 {offsets = [0, 7], sizes = [8, 29], strides = [1, 1]} : vector<8x36xf32> to vector<8x29xf32>
    %cst_15 = arith.constant dense<0.000000e+00> : vector<32x29xf32>
    %23 = tpu.matmul %21, %22, %cst_15 {dimension_numbers = #tpu.dot_dimension_numbers<[1], [0], [0], [1], [0, 0, 1, 1], [], []>} : vector<32x8xf32>, vector<8x29xf32>, vector<32x29xf32> -> vector<32x29xf32>
    %24 = arith.addf %19, %23 : vector<32x29xf32>
    %cst_16 = arith.constant 0.000000e+00 : f32
    %25 = vector.broadcast %cst_16 : f32 to vector<32x29xf32>
    %26 = arith.maximumf %24, %25 : vector<32x29xf32>
    %c0_17 = arith.constant 0 : index
    %c0_18 = arith.constant 0 : index
    %27 = vector.load %arg5[%c0_17, %c0_18] : memref<16x1xf32, #tpu.memory_space<vmem>>, vector<16x1xf32>
    %28 = vector.shape_cast %27 : vector<16x1xf32> to vector<16x1xf32>
    %29 = vector.broadcast %28 : vector<16x1xf32> to vector<16x22xf32>
    %c0_19 = arith.constant 0 : index
    %c0_20 = arith.constant 0 : index
    %c0_21 = arith.constant 0 : index
    %30 = vector.load %arg4[%c0_19, %c0_20, %c0_21] : memref<4x16x32xf32, #tpu.memory_space<vmem>>, vector<1x16x32xf32>
    %31 = vector.shape_cast %30 : vector<1x16x32xf32> to vector<16x32xf32>
    %32 = vector.extract_strided_slice %26 {offsets = [0, 0], sizes = [32, 22], strides = [1, 1]} : vector<32x29xf32> to vector<32x22xf32>
    %cst_22 = arith.constant dense<0.000000e+00> : vector<16x22xf32>
    %33 = tpu.matmul %31, %32, %cst_22 {dimension_numbers = #tpu.dot_dimension_numbers<[1], [0], [0], [1], [0, 0, 1, 1], [], []>} : vector<16x32xf32>, vector<32x22xf32>, vector<16x22xf32> -> vector<16x22xf32>
    %34 = arith.addf %29, %33 : vector<16x22xf32>
    %c1_23 = arith.constant 1 : index
    %c0_24 = arith.constant 0 : index
    %c0_25 = arith.constant 0 : index
    %35 = vector.load %arg4[%c1_23, %c0_24, %c0_25] : memref<4x16x32xf32, #tpu.memory_space<vmem>>, vector<1x16x32xf32>
    %36 = vector.shape_cast %35 : vector<1x16x32xf32> to vector<16x32xf32>
    %37 = vector.extract_strided_slice %26 {offsets = [0, 1], sizes = [32, 22], strides = [1, 1]} : vector<32x29xf32> to vector<32x22xf32>
    %cst_26 = arith.constant dense<0.000000e+00> : vector<16x22xf32>
    %38 = tpu.matmul %36, %37, %cst_26 {dimension_numbers = #tpu.dot_dimension_numbers<[1], [0], [0], [1], [0, 0, 1, 1], [], []>} : vector<16x32xf32>, vector<32x22xf32>, vector<16x22xf32> -> vector<16x22xf32>
    %39 = arith.addf %34, %38 : vector<16x22xf32>
    %c2_27 = arith.constant 2 : index
    %c0_28 = arith.constant 0 : index
    %c0_29 = arith.constant 0 : index
    %40 = vector.load %arg4[%c2_27, %c0_28, %c0_29] : memref<4x16x32xf32, #tpu.memory_space<vmem>>, vector<1x16x32xf32>
    %41 = vector.shape_cast %40 : vector<1x16x32xf32> to vector<16x32xf32>
    %42 = vector.extract_strided_slice %26 {offsets = [0, 6], sizes = [32, 22], strides = [1, 1]} : vector<32x29xf32> to vector<32x22xf32>
    %cst_30 = arith.constant dense<0.000000e+00> : vector<16x22xf32>
    %43 = tpu.matmul %41, %42, %cst_30 {dimension_numbers = #tpu.dot_dimension_numbers<[1], [0], [0], [1], [0, 0, 1, 1], [], []>} : vector<16x32xf32>, vector<32x22xf32>, vector<16x22xf32> -> vector<16x22xf32>
    %44 = arith.addf %39, %43 : vector<16x22xf32>
    %c3_31 = arith.constant 3 : index
    %c0_32 = arith.constant 0 : index
    %c0_33 = arith.constant 0 : index
    %45 = vector.load %arg4[%c3_31, %c0_32, %c0_33] : memref<4x16x32xf32, #tpu.memory_space<vmem>>, vector<1x16x32xf32>
    %46 = vector.shape_cast %45 : vector<1x16x32xf32> to vector<16x32xf32>
    %47 = vector.extract_strided_slice %26 {offsets = [0, 7], sizes = [32, 22], strides = [1, 1]} : vector<32x29xf32> to vector<32x22xf32>
    %cst_34 = arith.constant dense<0.000000e+00> : vector<16x22xf32>
    %48 = tpu.matmul %46, %47, %cst_34 {dimension_numbers = #tpu.dot_dimension_numbers<[1], [0], [0], [1], [0, 0, 1, 1], [], []>} : vector<16x32xf32>, vector<32x22xf32>, vector<16x22xf32> -> vector<16x22xf32>
    %49 = arith.addf %44, %48 : vector<16x22xf32>
    %cst_35 = arith.constant 0.000000e+00 : f32
    %50 = vector.broadcast %cst_35 : f32 to vector<16x22xf32>
    %51 = arith.maximumf %49, %50 : vector<16x22xf32>
    %c0_36 = arith.constant 0 : index
    %c0_37 = arith.constant 0 : index
    %52 = vector.load %arg10[%c0_36, %c0_37] : memref<22x100xf32, #tpu.memory_space<vmem>>, vector<22x100xf32>
    %cst_38 = arith.constant dense<0.000000e+00> : vector<16x100xf32>
    %53 = tpu.matmul %51, %52, %cst_38 {dimension_numbers = #tpu.dot_dimension_numbers<[1], [0], [0], [1], [0, 0, 1, 1], [], []>} : vector<16x22xf32>, vector<22x100xf32>, vector<16x100xf32> -> vector<16x100xf32>
    %c0_39 = arith.constant 0 : index
    %c0_40 = arith.constant 0 : index
    %54 = vector.load %arg7[%c0_39, %c0_40] : memref<1x1xf32, #tpu.memory_space<vmem>>, vector<1x1xf32>
    %55 = vector.shape_cast %54 : vector<1x1xf32> to vector<1x1xf32>
    %56 = vector.broadcast %55 : vector<1x1xf32> to vector<1x78xf32>
    %c0_41 = arith.constant 0 : index
    %c0_42 = arith.constant 0 : index
    %c0_43 = arith.constant 0 : index
    %57 = vector.load %arg6[%c0_41, %c0_42, %c0_43] : memref<9x1x16xf32, #tpu.memory_space<vmem>>, vector<1x1x16xf32>
    %58 = vector.shape_cast %57 : vector<1x1x16xf32> to vector<1x16xf32>
    %59 = vector.extract_strided_slice %53 {offsets = [0, 0], sizes = [16, 78], strides = [1, 1]} : vector<16x100xf32> to vector<16x78xf32>
    %cst_44 = arith.constant dense<0.000000e+00> : vector<1x78xf32>
    %60 = tpu.matmul %58, %59, %cst_44 {dimension_numbers = #tpu.dot_dimension_numbers<[1], [0], [0], [1], [0, 0, 1, 1], [], []>} : vector<1x16xf32>, vector<16x78xf32>, vector<1x78xf32> -> vector<1x78xf32>
    %61 = arith.addf %56, %60 : vector<1x78xf32>
    %c1_45 = arith.constant 1 : index
    %c0_46 = arith.constant 0 : index
    %c0_47 = arith.constant 0 : index
    %62 = vector.load %arg6[%c1_45, %c0_46, %c0_47] : memref<9x1x16xf32, #tpu.memory_space<vmem>>, vector<1x1x16xf32>
    %63 = vector.shape_cast %62 : vector<1x1x16xf32> to vector<1x16xf32>
    %64 = vector.extract_strided_slice %53 {offsets = [0, 1], sizes = [16, 78], strides = [1, 1]} : vector<16x100xf32> to vector<16x78xf32>
    %cst_48 = arith.constant dense<0.000000e+00> : vector<1x78xf32>
    %65 = tpu.matmul %63, %64, %cst_48 {dimension_numbers = #tpu.dot_dimension_numbers<[1], [0], [0], [1], [0, 0, 1, 1], [], []>} : vector<1x16xf32>, vector<16x78xf32>, vector<1x78xf32> -> vector<1x78xf32>
    %66 = arith.addf %61, %65 : vector<1x78xf32>
    %c2_49 = arith.constant 2 : index
    %c0_50 = arith.constant 0 : index
    %c0_51 = arith.constant 0 : index
    %67 = vector.load %arg6[%c2_49, %c0_50, %c0_51] : memref<9x1x16xf32, #tpu.memory_space<vmem>>, vector<1x1x16xf32>
    %68 = vector.shape_cast %67 : vector<1x1x16xf32> to vector<1x16xf32>
    %69 = vector.extract_strided_slice %53 {offsets = [0, 2], sizes = [16, 78], strides = [1, 1]} : vector<16x100xf32> to vector<16x78xf32>
    %cst_52 = arith.constant dense<0.000000e+00> : vector<1x78xf32>
    %70 = tpu.matmul %68, %69, %cst_52 {dimension_numbers = #tpu.dot_dimension_numbers<[1], [0], [0], [1], [0, 0, 1, 1], [], []>} : vector<1x16xf32>, vector<16x78xf32>, vector<1x78xf32> -> vector<1x78xf32>
    %71 = arith.addf %66, %70 : vector<1x78xf32>
    %c3_53 = arith.constant 3 : index
    %c0_54 = arith.constant 0 : index
    %c0_55 = arith.constant 0 : index
    %72 = vector.load %arg6[%c3_53, %c0_54, %c0_55] : memref<9x1x16xf32, #tpu.memory_space<vmem>>, vector<1x1x16xf32>
    %73 = vector.shape_cast %72 : vector<1x1x16xf32> to vector<1x16xf32>
    %74 = vector.extract_strided_slice %53 {offsets = [0, 10], sizes = [16, 78], strides = [1, 1]} : vector<16x100xf32> to vector<16x78xf32>
    %cst_56 = arith.constant dense<0.000000e+00> : vector<1x78xf32>
    %75 = tpu.matmul %73, %74, %cst_56 {dimension_numbers = #tpu.dot_dimension_numbers<[1], [0], [0], [1], [0, 0, 1, 1], [], []>} : vector<1x16xf32>, vector<16x78xf32>, vector<1x78xf32> -> vector<1x78xf32>
    %76 = arith.addf %71, %75 : vector<1x78xf32>
    %c4 = arith.constant 4 : index
    %c0_57 = arith.constant 0 : index
    %c0_58 = arith.constant 0 : index
    %77 = vector.load %arg6[%c4, %c0_57, %c0_58] : memref<9x1x16xf32, #tpu.memory_space<vmem>>, vector<1x1x16xf32>
    %78 = vector.shape_cast %77 : vector<1x1x16xf32> to vector<1x16xf32>
    %79 = vector.extract_strided_slice %53 {offsets = [0, 11], sizes = [16, 78], strides = [1, 1]} : vector<16x100xf32> to vector<16x78xf32>
    %cst_59 = arith.constant dense<0.000000e+00> : vector<1x78xf32>
    %80 = tpu.matmul %78, %79, %cst_59 {dimension_numbers = #tpu.dot_dimension_numbers<[1], [0], [0], [1], [0, 0, 1, 1], [], []>} : vector<1x16xf32>, vector<16x78xf32>, vector<1x78xf32> -> vector<1x78xf32>
    %81 = arith.addf %76, %80 : vector<1x78xf32>
    %c5 = arith.constant 5 : index
    %c0_60 = arith.constant 0 : index
    %c0_61 = arith.constant 0 : index
    %82 = vector.load %arg6[%c5, %c0_60, %c0_61] : memref<9x1x16xf32, #tpu.memory_space<vmem>>, vector<1x1x16xf32>
    %83 = vector.shape_cast %82 : vector<1x1x16xf32> to vector<1x16xf32>
    %84 = vector.extract_strided_slice %53 {offsets = [0, 12], sizes = [16, 78], strides = [1, 1]} : vector<16x100xf32> to vector<16x78xf32>
    %cst_62 = arith.constant dense<0.000000e+00> : vector<1x78xf32>
    %85 = tpu.matmul %83, %84, %cst_62 {dimension_numbers = #tpu.dot_dimension_numbers<[1], [0], [0], [1], [0, 0, 1, 1], [], []>} : vector<1x16xf32>, vector<16x78xf32>, vector<1x78xf32> -> vector<1x78xf32>
    %86 = arith.addf %81, %85 : vector<1x78xf32>
    %c6 = arith.constant 6 : index
    %c0_63 = arith.constant 0 : index
    %c0_64 = arith.constant 0 : index
    %87 = vector.load %arg6[%c6, %c0_63, %c0_64] : memref<9x1x16xf32, #tpu.memory_space<vmem>>, vector<1x1x16xf32>
    %88 = vector.shape_cast %87 : vector<1x1x16xf32> to vector<1x16xf32>
    %89 = vector.extract_strided_slice %53 {offsets = [0, 20], sizes = [16, 78], strides = [1, 1]} : vector<16x100xf32> to vector<16x78xf32>
    %cst_65 = arith.constant dense<0.000000e+00> : vector<1x78xf32>
    %90 = tpu.matmul %88, %89, %cst_65 {dimension_numbers = #tpu.dot_dimension_numbers<[1], [0], [0], [1], [0, 0, 1, 1], [], []>} : vector<1x16xf32>, vector<16x78xf32>, vector<1x78xf32> -> vector<1x78xf32>
    %91 = arith.addf %86, %90 : vector<1x78xf32>
    %c7 = arith.constant 7 : index
    %c0_66 = arith.constant 0 : index
    %c0_67 = arith.constant 0 : index
    %92 = vector.load %arg6[%c7, %c0_66, %c0_67] : memref<9x1x16xf32, #tpu.memory_space<vmem>>, vector<1x1x16xf32>
    %93 = vector.shape_cast %92 : vector<1x1x16xf32> to vector<1x16xf32>
    %94 = vector.extract_strided_slice %53 {offsets = [0, 21], sizes = [16, 78], strides = [1, 1]} : vector<16x100xf32> to vector<16x78xf32>
    %cst_68 = arith.constant dense<0.000000e+00> : vector<1x78xf32>
    %95 = tpu.matmul %93, %94, %cst_68 {dimension_numbers = #tpu.dot_dimension_numbers<[1], [0], [0], [1], [0, 0, 1, 1], [], []>} : vector<1x16xf32>, vector<16x78xf32>, vector<1x78xf32> -> vector<1x78xf32>
    %96 = arith.addf %91, %95 : vector<1x78xf32>
    %c8 = arith.constant 8 : index
    %c0_69 = arith.constant 0 : index
    %c0_70 = arith.constant 0 : index
    %97 = vector.load %arg6[%c8, %c0_69, %c0_70] : memref<9x1x16xf32, #tpu.memory_space<vmem>>, vector<1x1x16xf32>
    %98 = vector.shape_cast %97 : vector<1x1x16xf32> to vector<1x16xf32>
    %99 = vector.extract_strided_slice %53 {offsets = [0, 22], sizes = [16, 78], strides = [1, 1]} : vector<16x100xf32> to vector<16x78xf32>
    %cst_71 = arith.constant dense<0.000000e+00> : vector<1x78xf32>
    %100 = tpu.matmul %98, %99, %cst_71 {dimension_numbers = #tpu.dot_dimension_numbers<[1], [0], [0], [1], [0, 0, 1, 1], [], []>} : vector<1x16xf32>, vector<16x78xf32>, vector<1x78xf32> -> vector<1x78xf32>
    %101 = arith.addf %96, %100 : vector<1x78xf32>
    %c0_72 = arith.constant 0 : index
    %c0_73 = arith.constant 0 : index
    %102 = vector.load %arg11[%c0_72, %c0_73] : memref<78x324xf32, #tpu.memory_space<vmem>>, vector<78x324xf32>
    %cst_74 = arith.constant dense<0.000000e+00> : vector<1x324xf32>
    %103 = tpu.matmul %101, %102, %cst_74 {dimension_numbers = #tpu.dot_dimension_numbers<[1], [0], [0], [1], [0, 0, 1, 1], [], []>} : vector<1x78xf32>, vector<78x324xf32>, vector<1x324xf32> -> vector<1x324xf32>
    %c0_75 = arith.constant 0 : index
    %c0_76 = arith.constant 0 : index
    %104 = vector.load %arg9[%c0_75, %c0_76] : memref<1x1xf32, #tpu.memory_space<vmem>>, vector<1x1xf32>
    %105 = vector.shape_cast %104 : vector<1x1xf32> to vector<1x1xf32>
    %106 = vector.broadcast %105 : vector<1x1xf32> to vector<1x286xf32>
    %c0_77 = arith.constant 0 : index
    %c0_78 = arith.constant 0 : index
    %c0_79 = arith.constant 0 : index
    %107 = vector.load %arg8[%c0_77, %c0_78, %c0_79] : memref<9x1x1xf32, #tpu.memory_space<vmem>>, vector<1x1x1xf32>
    %108 = vector.shape_cast %107 : vector<1x1x1xf32> to vector<1x1xf32>
    %109 = vector.extract_strided_slice %103 {offsets = [0, 0], sizes = [1, 286], strides = [1, 1]} : vector<1x324xf32> to vector<1x286xf32>
    %110 = vector.broadcast %108 : vector<1x1xf32> to vector<1x286xf32>
    %111 = arith.mulf %110, %109 : vector<1x286xf32>
    %112 = arith.addf %106, %111 : vector<1x286xf32>
    %c1_80 = arith.constant 1 : index
    %c0_81 = arith.constant 0 : index
    %c0_82 = arith.constant 0 : index
    %113 = vector.load %arg8[%c1_80, %c0_81, %c0_82] : memref<9x1x1xf32, #tpu.memory_space<vmem>>, vector<1x1x1xf32>
    %114 = vector.shape_cast %113 : vector<1x1x1xf32> to vector<1x1xf32>
    %115 = vector.extract_strided_slice %103 {offsets = [0, 1], sizes = [1, 286], strides = [1, 1]} : vector<1x324xf32> to vector<1x286xf32>
    %116 = vector.broadcast %114 : vector<1x1xf32> to vector<1x286xf32>
    %117 = arith.mulf %116, %115 : vector<1x286xf32>
    %118 = arith.addf %112, %117 : vector<1x286xf32>
    %c2_83 = arith.constant 2 : index
    %c0_84 = arith.constant 0 : index
    %c0_85 = arith.constant 0 : index
    %119 = vector.load %arg8[%c2_83, %c0_84, %c0_85] : memref<9x1x1xf32, #tpu.memory_space<vmem>>, vector<1x1x1xf32>
    %120 = vector.shape_cast %119 : vector<1x1x1xf32> to vector<1x1xf32>
    %121 = vector.extract_strided_slice %103 {offsets = [0, 2], sizes = [1, 286], strides = [1, 1]} : vector<1x324xf32> to vector<1x286xf32>
    %122 = vector.broadcast %120 : vector<1x1xf32> to vector<1x286xf32>
    %123 = arith.mulf %122, %121 : vector<1x286xf32>
    %124 = arith.addf %118, %123 : vector<1x286xf32>
    %c3_86 = arith.constant 3 : index
    %c0_87 = arith.constant 0 : index
    %c0_88 = arith.constant 0 : index
    %125 = vector.load %arg8[%c3_86, %c0_87, %c0_88] : memref<9x1x1xf32, #tpu.memory_space<vmem>>, vector<1x1x1xf32>
    %126 = vector.shape_cast %125 : vector<1x1x1xf32> to vector<1x1xf32>
    %127 = vector.extract_strided_slice %103 {offsets = [0, 18], sizes = [1, 286], strides = [1, 1]} : vector<1x324xf32> to vector<1x286xf32>
    %128 = vector.broadcast %126 : vector<1x1xf32> to vector<1x286xf32>
    %129 = arith.mulf %128, %127 : vector<1x286xf32>
    %130 = arith.addf %124, %129 : vector<1x286xf32>
    %c4_89 = arith.constant 4 : index
    %c0_90 = arith.constant 0 : index
    %c0_91 = arith.constant 0 : index
    %131 = vector.load %arg8[%c4_89, %c0_90, %c0_91] : memref<9x1x1xf32, #tpu.memory_space<vmem>>, vector<1x1x1xf32>
    %132 = vector.shape_cast %131 : vector<1x1x1xf32> to vector<1x1xf32>
    %133 = vector.extract_strided_slice %103 {offsets = [0, 19], sizes = [1, 286], strides = [1, 1]} : vector<1x324xf32> to vector<1x286xf32>
    %134 = vector.broadcast %132 : vector<1x1xf32> to vector<1x286xf32>
    %135 = arith.mulf %134, %133 : vector<1x286xf32>
    %136 = arith.addf %130, %135 : vector<1x286xf32>
    %c5_92 = arith.constant 5 : index
    %c0_93 = arith.constant 0 : index
    %c0_94 = arith.constant 0 : index
    %137 = vector.load %arg8[%c5_92, %c0_93, %c0_94] : memref<9x1x1xf32, #tpu.memory_space<vmem>>, vector<1x1x1xf32>
    %138 = vector.shape_cast %137 : vector<1x1x1xf32> to vector<1x1xf32>
    %139 = vector.extract_strided_slice %103 {offsets = [0, 20], sizes = [1, 286], strides = [1, 1]} : vector<1x324xf32> to vector<1x286xf32>
    %140 = vector.broadcast %138 : vector<1x1xf32> to vector<1x286xf32>
    %141 = arith.mulf %140, %139 : vector<1x286xf32>
    %142 = arith.addf %136, %141 : vector<1x286xf32>
    %c6_95 = arith.constant 6 : index
    %c0_96 = arith.constant 0 : index
    %c0_97 = arith.constant 0 : index
    %143 = vector.load %arg8[%c6_95, %c0_96, %c0_97] : memref<9x1x1xf32, #tpu.memory_space<vmem>>, vector<1x1x1xf32>
    %144 = vector.shape_cast %143 : vector<1x1x1xf32> to vector<1x1xf32>
    %145 = vector.extract_strided_slice %103 {offsets = [0, 36], sizes = [1, 286], strides = [1, 1]} : vector<1x324xf32> to vector<1x286xf32>
    %146 = vector.broadcast %144 : vector<1x1xf32> to vector<1x286xf32>
    %147 = arith.mulf %146, %145 : vector<1x286xf32>
    %148 = arith.addf %142, %147 : vector<1x286xf32>
    %c7_98 = arith.constant 7 : index
    %c0_99 = arith.constant 0 : index
    %c0_100 = arith.constant 0 : index
    %149 = vector.load %arg8[%c7_98, %c0_99, %c0_100] : memref<9x1x1xf32, #tpu.memory_space<vmem>>, vector<1x1x1xf32>
    %150 = vector.shape_cast %149 : vector<1x1x1xf32> to vector<1x1xf32>
    %151 = vector.extract_strided_slice %103 {offsets = [0, 37], sizes = [1, 286], strides = [1, 1]} : vector<1x324xf32> to vector<1x286xf32>
    %152 = vector.broadcast %150 : vector<1x1xf32> to vector<1x286xf32>
    %153 = arith.mulf %152, %151 : vector<1x286xf32>
    %154 = arith.addf %148, %153 : vector<1x286xf32>
    %c8_101 = arith.constant 8 : index
    %c0_102 = arith.constant 0 : index
    %c0_103 = arith.constant 0 : index
    %155 = vector.load %arg8[%c8_101, %c0_102, %c0_103] : memref<9x1x1xf32, #tpu.memory_space<vmem>>, vector<1x1x1xf32>
    %156 = vector.shape_cast %155 : vector<1x1x1xf32> to vector<1x1xf32>
    %157 = vector.extract_strided_slice %103 {offsets = [0, 38], sizes = [1, 286], strides = [1, 1]} : vector<1x324xf32> to vector<1x286xf32>
    %158 = vector.broadcast %156 : vector<1x1xf32> to vector<1x286xf32>
    %159 = arith.mulf %158, %157 : vector<1x286xf32>
    %160 = arith.addf %154, %159 : vector<1x286xf32>
    %161 = arith.negf %160 : vector<1x286xf32>
    %162 = math.exp %161 : vector<1x286xf32>
    %cst_104 = arith.constant 1.000000e+00 : f32
    %163 = vector.broadcast %cst_104 : f32 to vector<1x286xf32>
    %164 = arith.addf %163, %162 : vector<1x286xf32>
    %165 = arith.divf %163, %164 : vector<1x286xf32>
    %166 = vector.extract_strided_slice %165 {offsets = [0, 0], sizes = [1, 16], strides = [1, 1]} : vector<1x286xf32> to vector<1x16xf32>
    %c0_105 = arith.constant 0 : index
    %c0_106 = arith.constant 0 : index
    %c0_107 = arith.constant 0 : index
    %167 = vector.load %arg12[%c0_105, %c0_106, %c0_107] : memref<1x1x256xf32, #tpu.memory_space<vmem>>, vector<1x1x16xf32>
    %168 = vector.shape_cast %167 : vector<1x1x16xf32> to vector<1x16xf32>
    %169 = vector.shape_cast %166 : vector<1x16xf32> to vector<1x1x16xf32>
    tpu.vector_store %arg12[%c0_105, %c0_106, %c0_107], %169 {strides = array<i32>} : memref<1x1x256xf32, #tpu.memory_space<vmem>>, vector<1x1x16xf32>,
    %170 = vector.extract_strided_slice %165 {offsets = [0, 18], sizes = [1, 16], strides = [1, 1]} : vector<1x286xf32> to vector<1x16xf32>
    %c0_108 = arith.constant 0 : index
    %c0_109 = arith.constant 0 : index
    %c16 = arith.constant 16 : index
    %171 = vector.load %arg12[%c0_108, %c0_109, %c16] : memref<1x1x256xf32, #tpu.memory_space<vmem>>, vector<1x1x16xf32>
    %172 = vector.shape_cast %171 : vector<1x1x16xf32> to vector<1x16xf32>
    %173 = vector.shape_cast %170 : vector<1x16xf32> to vector<1x1x16xf32>
    tpu.vector_store %arg12[%c0_108, %c0_109, %c16], %173 {strides = array<i32>} : memref<1x1x256xf32, #tpu.memory_space<vmem>>, vector<1x1x16xf32>,
    %174 = vector.extract_strided_slice %165 {offsets = [0, 36], sizes = [1, 16], strides = [1, 1]} : vector<1x286xf32> to vector<1x16xf32>
    %c0_110 = arith.constant 0 : index
    %c0_111 = arith.constant 0 : index
    %c32 = arith.constant 32 : index
    %175 = vector.load %arg12[%c0_110, %c0_111, %c32] : memref<1x1x256xf32, #tpu.memory_space<vmem>>, vector<1x1x16xf32>
    %176 = vector.shape_cast %175 : vector<1x1x16xf32> to vector<1x16xf32>
    %177 = vector.shape_cast %174 : vector<1x16xf32> to vector<1x1x16xf32>
    tpu.vector_store %arg12[%c0_110, %c0_111, %c32], %177 {strides = array<i32>} : memref<1x1x256xf32, #tpu.memory_space<vmem>>, vector<1x1x16xf32>,
    %178 = vector.extract_strided_slice %165 {offsets = [0, 54], sizes = [1, 16], strides = [1, 1]} : vector<1x286xf32> to vector<1x16xf32>
    %c0_112 = arith.constant 0 : index
    %c0_113 = arith.constant 0 : index
    %c48 = arith.constant 48 : index
    %179 = vector.load %arg12[%c0_112, %c0_113, %c48] : memref<1x1x256xf32, #tpu.memory_space<vmem>>, vector<1x1x16xf32>
    %180 = vector.shape_cast %179 : vector<1x1x16xf32> to vector<1x16xf32>
    %181 = vector.shape_cast %178 : vector<1x16xf32> to vector<1x1x16xf32>
    tpu.vector_store %arg12[%c0_112, %c0_113, %c48], %181 {strides = array<i32>} : memref<1x1x256xf32, #tpu.memory_space<vmem>>, vector<1x1x16xf32>,
    %182 = vector.extract_strided_slice %165 {offsets = [0, 72], sizes = [1, 16], strides = [1, 1]} : vector<1x286xf32> to vector<1x16xf32>
    %c0_114 = arith.constant 0 : index
    %c0_115 = arith.constant 0 : index
    %c64 = arith.constant 64 : index
    %183 = vector.load %arg12[%c0_114, %c0_115, %c64] : memref<1x1x256xf32, #tpu.memory_space<vmem>>, vector<1x1x16xf32>
    %184 = vector.shape_cast %183 : vector<1x1x16xf32> to vector<1x16xf32>
    %185 = vector.shape_cast %182 : vector<1x16xf32> to vector<1x1x16xf32>
    tpu.vector_store %arg12[%c0_114, %c0_115, %c64], %185 {strides = array<i32>} : memref<1x1x256xf32, #tpu.memory_space<vmem>>, vector<1x1x16xf32>,
    %186 = vector.extract_strided_slice %165 {offsets = [0, 90], sizes = [1, 16], strides = [1, 1]} : vector<1x286xf32> to vector<1x16xf32>
    %c0_116 = arith.constant 0 : index
    %c0_117 = arith.constant 0 : index
    %c80 = arith.constant 80 : index
    %187 = vector.load %arg12[%c0_116, %c0_117, %c80] : memref<1x1x256xf32, #tpu.memory_space<vmem>>, vector<1x1x16xf32>
    %188 = vector.shape_cast %187 : vector<1x1x16xf32> to vector<1x16xf32>
    %189 = vector.shape_cast %186 : vector<1x16xf32> to vector<1x1x16xf32>
    tpu.vector_store %arg12[%c0_116, %c0_117, %c80], %189 {strides = array<i32>} : memref<1x1x256xf32, #tpu.memory_space<vmem>>, vector<1x1x16xf32>,
    %190 = vector.extract_strided_slice %165 {offsets = [0, 108], sizes = [1, 16], strides = [1, 1]} : vector<1x286xf32> to vector<1x16xf32>
    %c0_118 = arith.constant 0 : index
    %c0_119 = arith.constant 0 : index
    %c96 = arith.constant 96 : index
    %191 = vector.load %arg12[%c0_118, %c0_119, %c96] : memref<1x1x256xf32, #tpu.memory_space<vmem>>, vector<1x1x16xf32>
    %192 = vector.shape_cast %191 : vector<1x1x16xf32> to vector<1x16xf32>
    %193 = vector.shape_cast %190 : vector<1x16xf32> to vector<1x1x16xf32>
    tpu.vector_store %arg12[%c0_118, %c0_119, %c96], %193 {strides = array<i32>} : memref<1x1x256xf32, #tpu.memory_space<vmem>>, vector<1x1x16xf32>,
    %194 = vector.extract_strided_slice %165 {offsets = [0, 126], sizes = [1, 16], strides = [1, 1]} : vector<1x286xf32> to vector<1x16xf32>
    %c0_120 = arith.constant 0 : index
    %c0_121 = arith.constant 0 : index
    %c112 = arith.constant 112 : index
    %195 = vector.load %arg12[%c0_120, %c0_121, %c112] : memref<1x1x256xf32, #tpu.memory_space<vmem>>, vector<1x1x16xf32>
    %196 = vector.shape_cast %195 : vector<1x1x16xf32> to vector<1x16xf32>
    %197 = vector.shape_cast %194 : vector<1x16xf32> to vector<1x1x16xf32>
    tpu.vector_store %arg12[%c0_120, %c0_121, %c112], %197 {strides = array<i32>} : memref<1x1x256xf32, #tpu.memory_space<vmem>>, vector<1x1x16xf32>,
    %198 = vector.extract_strided_slice %165 {offsets = [0, 144], sizes = [1, 16], strides = [1, 1]} : vector<1x286xf32> to vector<1x16xf32>
    %c0_122 = arith.constant 0 : index
    %c0_123 = arith.constant 0 : index
    %c128 = arith.constant 128 : index
    %199 = vector.load %arg12[%c0_122, %c0_123, %c128] : memref<1x1x256xf32, #tpu.memory_space<vmem>>, vector<1x1x16xf32>
    %200 = vector.shape_cast %199 : vector<1x1x16xf32> to vector<1x16xf32>
    %201 = vector.shape_cast %198 : vector<1x16xf32> to vector<1x1x16xf32>
    tpu.vector_store %arg12[%c0_122, %c0_123, %c128], %201 {strides = array<i32>} : memref<1x1x256xf32, #tpu.memory_space<vmem>>, vector<1x1x16xf32>,
    %202 = vector.extract_strided_slice %165 {offsets = [0, 162], sizes = [1, 16], strides = [1, 1]} : vector<1x286xf32> to vector<1x16xf32>
    %c0_124 = arith.constant 0 : index
    %c0_125 = arith.constant 0 : index
    %c144 = arith.constant 144 : index
    %203 = vector.load %arg12[%c0_124, %c0_125, %c144] : memref<1x1x256xf32, #tpu.memory_space<vmem>>, vector<1x1x16xf32>
    %204 = vector.shape_cast %203 : vector<1x1x16xf32> to vector<1x16xf32>
    %205 = vector.shape_cast %202 : vector<1x16xf32> to vector<1x1x16xf32>
    tpu.vector_store %arg12[%c0_124, %c0_125, %c144], %205 {strides = array<i32>} : memref<1x1x256xf32, #tpu.memory_space<vmem>>, vector<1x1x16xf32>,
    %206 = vector.extract_strided_slice %165 {offsets = [0, 180], sizes = [1, 16], strides = [1, 1]} : vector<1x286xf32> to vector<1x16xf32>
    %c0_126 = arith.constant 0 : index
    %c0_127 = arith.constant 0 : index
    %c160 = arith.constant 160 : index
    %207 = vector.load %arg12[%c0_126, %c0_127, %c160] : memref<1x1x256xf32, #tpu.memory_space<vmem>>, vector<1x1x16xf32>
    %208 = vector.shape_cast %207 : vector<1x1x16xf32> to vector<1x16xf32>
    %209 = vector.shape_cast %206 : vector<1x16xf32> to vector<1x1x16xf32>
    tpu.vector_store %arg12[%c0_126, %c0_127, %c160], %209 {strides = array<i32>} : memref<1x1x256xf32, #tpu.memory_space<vmem>>, vector<1x1x16xf32>,
    %210 = vector.extract_strided_slice %165 {offsets = [0, 198], sizes = [1, 16], strides = [1, 1]} : vector<1x286xf32> to vector<1x16xf32>
    %c0_128 = arith.constant 0 : index
    %c0_129 = arith.constant 0 : index
    %c176 = arith.constant 176 : index
    %211 = vector.load %arg12[%c0_128, %c0_129, %c176] : memref<1x1x256xf32, #tpu.memory_space<vmem>>, vector<1x1x16xf32>
    %212 = vector.shape_cast %211 : vector<1x1x16xf32> to vector<1x16xf32>
    %213 = vector.shape_cast %210 : vector<1x16xf32> to vector<1x1x16xf32>
    tpu.vector_store %arg12[%c0_128, %c0_129, %c176], %213 {strides = array<i32>} : memref<1x1x256xf32, #tpu.memory_space<vmem>>, vector<1x1x16xf32>,
    %214 = vector.extract_strided_slice %165 {offsets = [0, 216], sizes = [1, 16], strides = [1, 1]} : vector<1x286xf32> to vector<1x16xf32>
    %c0_130 = arith.constant 0 : index
    %c0_131 = arith.constant 0 : index
    %c192 = arith.constant 192 : index
    %215 = vector.load %arg12[%c0_130, %c0_131, %c192] : memref<1x1x256xf32, #tpu.memory_space<vmem>>, vector<1x1x16xf32>
    %216 = vector.shape_cast %215 : vector<1x1x16xf32> to vector<1x16xf32>
    %217 = vector.shape_cast %214 : vector<1x16xf32> to vector<1x1x16xf32>
    tpu.vector_store %arg12[%c0_130, %c0_131, %c192], %217 {strides = array<i32>} : memref<1x1x256xf32, #tpu.memory_space<vmem>>, vector<1x1x16xf32>,
    %218 = vector.extract_strided_slice %165 {offsets = [0, 234], sizes = [1, 16], strides = [1, 1]} : vector<1x286xf32> to vector<1x16xf32>
    %c0_132 = arith.constant 0 : index
    %c0_133 = arith.constant 0 : index
    %c208 = arith.constant 208 : index
    %219 = vector.load %arg12[%c0_132, %c0_133, %c208] : memref<1x1x256xf32, #tpu.memory_space<vmem>>, vector<1x1x16xf32>
    %220 = vector.shape_cast %219 : vector<1x1x16xf32> to vector<1x16xf32>
    %221 = vector.shape_cast %218 : vector<1x16xf32> to vector<1x1x16xf32>
    tpu.vector_store %arg12[%c0_132, %c0_133, %c208], %221 {strides = array<i32>} : memref<1x1x256xf32, #tpu.memory_space<vmem>>, vector<1x1x16xf32>,
    %222 = vector.extract_strided_slice %165 {offsets = [0, 252], sizes = [1, 16], strides = [1, 1]} : vector<1x286xf32> to vector<1x16xf32>
    %c0_134 = arith.constant 0 : index
    %c0_135 = arith.constant 0 : index
    %c224 = arith.constant 224 : index
    %223 = vector.load %arg12[%c0_134, %c0_135, %c224] : memref<1x1x256xf32, #tpu.memory_space<vmem>>, vector<1x1x16xf32>
    %224 = vector.shape_cast %223 : vector<1x1x16xf32> to vector<1x16xf32>
    %225 = vector.shape_cast %222 : vector<1x16xf32> to vector<1x1x16xf32>
    tpu.vector_store %arg12[%c0_134, %c0_135, %c224], %225 {strides = array<i32>} : memref<1x1x256xf32, #tpu.memory_space<vmem>>, vector<1x1x16xf32>,
    %226 = vector.extract_strided_slice %165 {offsets = [0, 270], sizes = [1, 16], strides = [1, 1]} : vector<1x286xf32> to vector<1x16xf32>
    %c0_136 = arith.constant 0 : index
    %c0_137 = arith.constant 0 : index
    %c240 = arith.constant 240 : index
    %227 = vector.load %arg12[%c0_136, %c0_137, %c240] : memref<1x1x256xf32, #tpu.memory_space<vmem>>, vector<1x1x16xf32>
    %228 = vector.shape_cast %227 : vector<1x1x16xf32> to vector<1x16xf32>
    %229 = vector.shape_cast %226 : vector<1x16xf32> to vector<1x1x16xf32>
    tpu.vector_store %arg12[%c0_136, %c0_137, %c240], %229 {strides = array<i32>} : memref<1x1x256xf32, #tpu.memory_space<vmem>>, vector<1x1x16xf32>,
    return
  }
  func.func @transform_0(%arg0: i32) -> (i32, i32, i32) {
    %c0_i32 = arith.constant 0 : i32
    %c0_i32_0 = arith.constant 0 : i32
    %c0_i32_1 = arith.constant 0 : i32
    return %arg0, %c0_i32, %c0_i32_0 : i32, i32, i32
  }
  func.func @transform_1(%arg0: i32) -> (i32, i32, i32) {
    %c0_i32 = arith.constant 0 : i32
    %c0_i32_0 = arith.constant 0 : i32
    %c0_i32_1 = arith.constant 0 : i32
    %c0_i32_2 = arith.constant 0 : i32
    return %c0_i32, %c0_i32_0, %c0_i32_1 : i32, i32, i32
  }
  func.func @transform_2(%arg0: i32) -> (i32, i32) {
    %c0_i32 = arith.constant 0 : i32
    %c0_i32_0 = arith.constant 0 : i32
    %c0_i32_1 = arith.constant 0 : i32
    return %c0_i32, %c0_i32_0 : i32, i32
  }
  func.func @transform_3(%arg0: i32) -> (i32, i32, i32) {
    %c0_i32 = arith.constant 0 : i32
    %c0_i32_0 = arith.constant 0 : i32
    %c0_i32_1 = arith.constant 0 : i32
    %c0_i32_2 = arith.constant 0 : i32
    return %c0_i32, %c0_i32_0, %c0_i32_1 : i32, i32, i32
  }
  func.func @transform_4(%arg0: i32) -> (i32, i32) {
    %c0_i32 = arith.constant 0 : i32
    %c0_i32_0 = arith.constant 0 : i32
    %c0_i32_1 = arith.constant 0 : i32
    return %c0_i32, %c0_i32_0 : i32, i32
  }
  func.func @transform_5(%arg0: i32) -> (i32, i32, i32) {
    %c0_i32 = arith.constant 0 : i32
    %c0_i32_0 = arith.constant 0 : i32
    %c0_i32_1 = arith.constant 0 : i32
    %c0_i32_2 = arith.constant 0 : i32
    return %c0_i32, %c0_i32_0, %c0_i32_1 : i32, i32, i32
  }
  func.func @transform_6(%arg0: i32) -> (i32, i32) {
    %c0_i32 = arith.constant 0 : i32
    %c0_i32_0 = arith.constant 0 : i32
    %c0_i32_1 = arith.constant 0 : i32
    return %c0_i32, %c0_i32_0 : i32, i32
  }
  func.func @transform_7(%arg0: i32) -> (i32, i32, i32) {
    %c0_i32 = arith.constant 0 : i32
    %c0_i32_0 = arith.constant 0 : i32
    %c0_i32_1 = arith.constant 0 : i32
    %c0_i32_2 = arith.constant 0 : i32
    return %c0_i32, %c0_i32_0, %c0_i32_1 : i32, i32, i32
  }
  func.func @transform_8(%arg0: i32) -> (i32, i32) {
    %c0_i32 = arith.constant 0 : i32
    %c0_i32_0 = arith.constant 0 : i32
    %c0_i32_1 = arith.constant 0 : i32
    return %c0_i32, %c0_i32_0 : i32, i32
  }
  func.func @transform_9(%arg0: i32) -> (i32, i32) {
    %c0_i32 = arith.constant 0 : i32
    %c0_i32_0 = arith.constant 0 : i32
    %c0_i32_1 = arith.constant 0 : i32
    return %c0_i32, %c0_i32_0 : i32, i32
  }
  func.func @transform_10(%arg0: i32) -> (i32, i32) {
    %c0_i32 = arith.constant 0 : i32
    %c0_i32_0 = arith.constant 0 : i32
    %c0_i32_1 = arith.constant 0 : i32
    return %c0_i32, %c0_i32_0 : i32, i32
  }
  func.func @transform_11(%arg0: i32) -> (i32, i32, i32) {
    %c0_i32 = arith.constant 0 : i32
    %c0_i32_0 = arith.constant 0 : i32
    %c0_i32_1 = arith.constant 0 : i32
    return %arg0, %c0_i32, %c0_i32_0 : i32, i32, i32
  }
}

</mosaic_0001>

<bundles_post_ra>
// kernel: decoder_forward.1
= control target key start
LH: loop header
LB: loop body
LE: loop exit
PB: predicated region body
PF: predicated region fallthrough
CT: control target
= control target key end

     0   :  { %s3279_s21 = smov 0   ;;  %s3860_s0 = inlined_call_operand.vmem [shape: f32[2,8,36], index: 0, kind: input, shape index: {}]   ;;  %s3861_s1 = inlined_call_operand.vmem [shape: f32[4,32,8], index: 1, kind: input, shape index: {}]   ;;  %s3862_s2 = inlined_call_operand.vmem [shape: f32[32,1], index: 2, kind: input, shape index: {}]   ;;  %s3863_s3 = inlined_call_operand.vmem [shape: f32[4,16,32], index: 3, kind: input, shape index: {}]   ;;  %s3864_s4 = inlined_call_operand.vmem [shape: f32[16,1], index: 4, kind: input, shape index: {}]   ;;  %s3865_s5 = inlined_call_operand.vmem [shape: f32[9,1,16], index: 5, kind: input, shape index: {}]   ;;  %s3866_s6 = inlined_call_operand.<no memory space> [shape: f32[1,1], index: 6, kind: input, shape index: {}]   ;;  %s3867_s7 = inlined_call_operand.vmem [shape: f32[9,1,1], index: 7, kind: input, shape index: {}]   ;;  %s3868_s9 = inlined_call_operand.vmem [shape: f32[22,100], index: 9, kind: input, shape index: {}]   ;;  %s3869_s10 = inlined_call_operand.vmem [shape: f32[78,324], index: 10, kind: input, shape index: {}]   ;;  %s3870_s11 = inlined_call_operand.vmem [shape: f32[2,1,256], index: 11, kind: output, shape index: {}]   ;;  %s3871_s8 = inlined_call_operand.<no memory space> [shape: f32[1,1], index: 8, kind: input, shape index: {}]  }
   0x1   :  { %v16_v0 = vstv %s3866_s6  ;;  %v18_v1 = vstv %s3871_s8 }
   0x2   :  { %17 = vst [vmem:[#allocation2] sm:$0x1] %v16_v0  ;;  %19 = vst [vmem:[#allocation3] sm:$0x1] %v18_v1 }
   0x3 LB: > { %s2784_s22 = sadd.s32 4294967295, %s3184_s21   ;;  %p2788_p0 = scmp.ge.s32.totalorder %s3184_s21, 1  ;;  %s3184_s21 = sphi %s3279_s21, %s25_s21  }
   0x4   : > { %p340_p1 = scmp.lt.s32.totalorder %s3184_s21, 3 }
   0x6   : > { %p341_p2 = pnand %p2788_p0, %p340_p1 }
   0x7   : > { %p378_p3 = scmp.lt.s32.totalorder (!%p341_p2), %s2784_s22, 1  ;;  %s3186_s29 = smov (!%p341_p2), 127  }
   0x8   : > { %344 = sbr.rel (%p341_p2) target bundleno = 1750 (0x6d6), region = 64  ;;  %s3187_s30 = smov (!%p341_p2), 121  }
   0x9   : > { %s3189_s18 = smov (!%p341_p2), 122   ;;  %s3194_s12 = smov (!%p341_p2), 117  }
   0xa   : > { %s3195_s13 = smov (!%p341_p2), 116   ;;  %s3196_s14 = smov (!%p341_p2), 108  }
   0xb   : > { %s3197_s15 = smov (!%p341_p2), 107   ;;  %s3198_s16 = smov (!%p341_p2), 106  }
   0xc   : > { %s3201_s17 = smov (!%p341_p2), 92   ;;  %s3202_s19 = smov (!%p341_p2), 91  }
   0xd   : > { %v411_v2 = vld [vmem:[%s3861_s1] sm:$0xff]  ;;  %vm415_vm0 = vcmask 64512   ;;  %s3901_s22 = smov (!%p378_p3, %s2784_s22), 1  ;;  %v412_v5 = vld [vmem:[%s3861_s1 + $0x8] sm:$0xff]  ;;  %v413_v6 = vld [vmem:[%s3861_s1 + $0x10] sm:$0xff]  ;;  %v3188_v7 = vmov 0  }
   0xe   : > { %2960 = vmatprep.mubr.msk.f32.mxu0 %vm415_vm0, %v411_v2  ;;  %v2795_v3 = vld [vmem:[%s3861_s1 + $0x20] sm:$0xff]  ;;  %s2789_s25 = sshll.u32 %s3901_s22, 3  ;;  %3164 = vset.pattern.permute.xlu1 %v3188_v7  ;;  %v390_v8 = vld [vmem:[%s3862_s2 + $0x18] sm:$0xff]  ;;  %v389_v11 = vld [vmem:[%s3862_s2 + $0x10] sm:$0xff]  ;;  %vm863_vm1 = vcmask 261120   ;;  %vm1257_vm2 = vcmask 1045504  }
   0xf   : > { %2968 = vmatprep.mubr.msk.f32.mxu1 %vm415_vm0, %v2795_v3  ;;  %s381_s28 = scalar_lea.vmem %s3860_s0, %s2789_s25  ;;  %3165 = vset.pattern.permute.xlu0 %v3188_v7  ;;  %v414_v9 = vld [vmem:[%s3861_s1 + $0x18] sm:$0xff]  ;;  %v2803_v10 = vld [vmem:[%s3861_s1 + $0x40] sm:$0xff]  ;;  %v388_v12 = vld [vmem:[%s3862_s2 + $0x8] sm:$0xff]  ;;  %vm1250_vm3 = vcmask 179200   ;;  %vm3191_vm4 = vmmov 0   ;;  %vm1347_vm5 = vcmask 130048  }
  0x10   : > { %v386_v4 = vld [vmem:[%s381_s28] sm:$0xff]  ;;  %v2796_v15 = vld [vmem:[%s3861_s1 + $0x28] sm:$0xff]  ;;  %v2797_v17 = vld [vmem:[%s3861_s1 + $0x30] sm:$0xff]  ;;  %s3192_s28 = smov 126   ;;  %vm2110_vm6 = vcmask 637952   ;;  %s3203_s20 = smov 90  }
  0x11   : > { %523 = vrot.lane.b32.xlu0 %v386_v4, %s3186_s29  ;;  %741 = vrot.lane.b32.xlu1 %v386_v4, %s3187_s30  ;;  %v387_v13 = vld [vmem:[%s3862_s2] sm:$0xff]  ;;  %v2798_v19 = vld [vmem:[%s3861_s1 + $0x38] sm:$0xff]  ;;  %vm2313_vm7 = vcmask 1039360   ;;  %vm2345_vm8 = vcmask 1031168   ;;  %vm2377_vm9 = vcmask 900096   ;;  %vm2409_vm10 = vcmask 891904  }
  0x12   : > { %2958 = vmatprep.subr.mxu0 %v386_v4  ;;  %v2804_v20 = vld [vmem:[%s3861_s1 + $0x48] sm:$0xff]  ;;  %v2805_v21 = vld [vmem:[%s3861_s1 + $0x50] sm:$0xff]  ;;  %v2811_v22 = vld [vmem:[%s3861_s1 + $0x60] sm:$0xff]  ;;  %vm2441_vm11 = vcmask 883712   ;;  %vm2473_vm12 = vcmask 752640   ;;  %vm2505_vm13 = vcmask 744448  }
  0x13   : > { %2959 = vmatpush3.msra.mxu0 %v386_v4  ;;  %v2806_v23 = vld [vmem:[%s3861_s1 + $0x58] sm:$0xff]  ;;  %v2812_v24 = vld [vmem:[%s3861_s1 + $0x68] sm:$0xff]  ;;  %v2813_v25 = vld [vmem:[%s3861_s1 + $0x70] sm:$0xff]  ;;  %vm2537_vm14 = vcmask 736256   ;;  %s3206_s24 = smov 124   ;;  %s3207_s25 = smov 100  }
  0x14   : > { %2961 = vmatmul.mubr.msk.f32.vlgmr.msra.gmra.mxu0 %vm415_vm0, %v412_v5  ;;  %v2814_v26 = vld [vmem:[%s3861_s1 + $0x78] sm:$0xff]  ;;  %v861_v27 = vld [vmem:[%s3863_s3] sm:$0xff]  ;;  %v2821_v63 = vld [vmem:[%s3863_s3 + $0x10] sm:$0xff]  ;;  %s3208_s26 = smov 120   ;;  %s3210_s27 = smov 104  }
  0x15   : > { %632 = vrot.lane.b32.xlu0 %v386_v4, %s3189_s18  ;;  %2963 = vmatprep.mubr.msk.f32.mxu0 %vm415_vm0, %v413_v6  ;;  %v862_v5 = vld [vmem:[%s3863_s3 + $0x8] sm:$0xff]  ;;  %v2825_v6 = vld [vmem:[%s3863_s3 + $0x20] sm:$0xff] }
  0x16   : > { %408 = vperm.xlu1 %3164, %v390_v8   ;;  %v849_v7 = vld [vmem:[%s3864_s4] sm:$0xff]  ;;  %v850_v8 = vld [vmem:[%s3864_s4 + $0x8] sm:$0xff] }
  0x18   : > { %2964 = vmatmul.mubr.msk.f32.gmra.mxu0 %vm415_vm0, %v414_v9 }
  0x19   : > { %2976 = vmatprep.mubr.msk.f32.mxu0 %vm415_vm0, %v2803_v10  ;;  %403 = vperm.xlu0 %3165, %v389_v11  }
  0x1a   : > { %398 = vperm.xlu1 %3164, %v388_v12  }
  0x1e   : > { %393 = vperm.xlu1 %3164, %v387_v13  }
  0x83   : > { %v524_v14 = vpop.permute.xlu0 %523  ;;  %v742_v16 = vpop.permute.xlu1 %741 }
  0x84   : > { %2966 = vmatprep.subr.mxu1 %v524_v14 }
  0x85   : > { %2967 = vmatpush3.msra.mxu1 %v524_v14 }
  0x86   : > { %2969 = vmatmul.mubr.msk.f32.vlgmr.msra.gmra.mxu1 %vm415_vm0, %v2796_v15  ;;  %2982 = vmatprep.subr.mxu1 %v742_v16 }
  0x87   : > { %v633_v18 = vpop.permute.xlu0 %632  ;;  %2971 = vmatprep.mubr.msk.f32.mxu1 %vm415_vm0, %v2797_v17  ;;  %2983 = vmatpush3.msra.mxu1 %v742_v16  ;;  %v2822_v17 = vld [vmem:[%s3863_s3 + $0x18] sm:$0xff] }
  0x88   : > { %2974 = vmatprep.subr.mxu0 %v633_v18 }
  0x89   : > { %2975 = vmatpush3.msra.mxu0 %v633_v18 }
  0x8a   : > { %2972 = vmatmul.mubr.msk.f32.gmra.mxu1 %vm415_vm0, %v2798_v19  ;;  %2977 = vmatmul.mubr.msk.f32.vlgmr.msra.gmra.mxu0 %vm415_vm0, %v2804_v20  ;;  %v2826_v20 = vld [vmem:[%s3863_s3 + $0x28] sm:$0xff] }
  0x8b   : > { %2979 = vmatprep.mubr.msk.f32.mxu0 %vm415_vm0, %v2805_v21  ;;  %2984 = vmatprep.mubr.msk.f32.mxu1 %vm415_vm0, %v2811_v22  ;;  %v2829_v21 = vld [vmem:[%s3863_s3 + $0x30] sm:$0xff] }
  0x8e   : > { %2980 = vmatmul.mubr.msk.f32.gmra.mxu0 %vm415_vm0, %v2806_v23  ;;  %2985 = vmatmul.mubr.msk.f32.vlgmr.msra.gmra.mxu1 %vm415_vm0, %v2812_v24  ;;  %v2830_v24 = vld [vmem:[%s3863_s3 + $0x38] sm:$0xff] }
  0x8f   : > { %2987 = vmatprep.mubr.msk.f32.mxu1 %vm415_vm0, %v2813_v25  ;;  %2998 = vmatprep.mubr.msk.f32.mxu0 %vm863_vm1, %v861_v27  ;;  %v1249_v25 = vld [vmem:[%s3868_s9 + $0x10] sm:$0x3f]  ;;  %v1247_v27 = vld [vmem:[%s3868_s9] sm:$0xff] }
  0x91   : > { %v409_v28 = vpop.permute.xlu1 %408 }
  0x92   : > { %2988 = vmatmul.mubr.msk.f32.gmra.mxu1 %vm415_vm0, %v2814_v26  ;;  %v1248_v26 = vld [vmem:[%s3868_s9 + $0x8] sm:$0xff] }
  0x93   : > { %3009 = vmatprep.mubr.msk.f32.mxu1 %vm863_vm1, %v2821_v63 }
  0x94   : > { %v404_v42 = vpop.permute.xlu0 %403 }
  0x95   : > { %v399_v31 = vpop.permute.xlu1 %398 }
  0x99   : > { %v394_v36 = vpop.permute.xlu1 %393 }
  0xd4   : > { %v2962_v29 = vpop.f32.mrf.mxu0 }
  0xd5   : > { %v514_v35 = vadd.f32 %v2962_v29, %v399_v31 }
  0xd6   : > { %v494_v30 = vpop.f32.mrf.mxu0 }
  0xd7   : > { %v513_v41 = vadd.f32 %v494_v30, %v394_v36 }
  0xd8   : > { %v2965_v32 = vpop.f32.mrf.mxu0 }
  0xd9   : > { %v516_v45 = vadd.f32 %v2965_v32, %v409_v28 }
  0xda   : > { %v504_v34 = vpop.f32.mrf.mxu0 }
  0xdb   : > { %v515_v51 = vadd.f32 %v504_v34, %v404_v42 }
 0x146   : > { %v2970_v33 = vpop.f32.mrf.mxu1 }
 0x147   : > { %v624_v40 = vadd.f32 %v2970_v33, %v514_v35 }
 0x148   : > { %v604_v37 = vpop.f32.mrf.mxu1 }
 0x149   : > { %v623_v46 = vadd.f32 %v604_v37, %v513_v41 }
 0x14a   : > { %v2973_v38 = vpop.f32.mrf.mxu1  ;;  %v2978_v39 = vpop.f32.mrf.mxu0 }
 0x14b   : > { %v733_v47 = vadd.f32 %v2978_v39, %v624_v40  ;;  %v626_v50 = vadd.f32 %v2973_v38, %v516_v45 }
 0x14c   : > { %v614_v43 = vpop.f32.mrf.mxu1  ;;  %v713_v44 = vpop.f32.mrf.mxu0 }
 0x14d   : > { %v732_v52 = vadd.f32 %v713_v44, %v623_v46  ;;  %v625_v58 = vadd.f32 %v614_v43, %v515_v51 }
 0x14e   : > { %v2981_v48 = vpop.f32.mrf.mxu0  ;;  %v2986_v49 = vpop.f32.mrf.mxu1 }
 0x14f   : > { %v842_v53 = vadd.f32 %v2986_v49, %v733_v47  ;;  %v735_v56 = vadd.f32 %v2981_v48, %v626_v50  ;;  %v3190_v48 = vmov 0.0   ;;  %v1346_v50 = vld [vmem:[%s3865_s5] sm:$0x1] }
 0x150   : > { %v723_v54 = vpop.f32.mrf.mxu0  ;;  %v822_v55 = vpop.f32.mrf.mxu1 }
 0x151   : > { %v846_v57 = vmax.f32 %v842_v53, 0.0  ;;  %v841_v59 = vadd.f32 %v822_v55, %v732_v52  ;;  %v734_v61 = vadd.f32 %v723_v54, %v625_v58  ;;  %v1336_v52 = vld [vmem:[#allocation2] sm:$0x1]  ;;  %v2858_v53 = vld [vmem:[%s3867_s7 + $0x1] sm:$0x1] }
 0x152   : > { %v2989_v60 = vpop.f32.mrf.mxu1  ;;  %v2859_v54 = vld [vmem:[%s3867_s7 + $0x2] sm:$0x1]  ;;  %v2860_v55 = vld [vmem:[%s3867_s7 + $0x3] sm:$0x1]  ;;  %v2863_v58 = vld [vmem:[%s3867_s7 + $0x6] sm:$0x1] }
 0x153   : > { %v844_v62 = vadd.f32 %v2989_v60, %v735_v56  ;;  %1054 = vrot.lane.b32.xlu1 %v846_v57, %s3189_s18  ;;  %956 = vrot.lane.b32.xlu0 %v846_v57, %s3186_s29  ;;  %v845_v1 = vmax.f32 %v841_v59, 0.0  ;;  %v2861_v56 = vld [vmem:[%s3867_s7 + $0x4] sm:$0x1]  ;;  %v2864_v59 = vld [vmem:[%s3867_s7 + $0x7] sm:$0x1] }
 0x154   : > { %v832_v0 = vpop.f32.mrf.mxu1  ;;  %v2865_v60 = vld [vmem:[%s3867_s7 + $0x8] sm:$0x1] }
 0x155   : > { %v848_v2 = vmax.f32 %v844_v62, 0.0  ;;  %v843_v3 = vadd.f32 %v832_v0, %v734_v61  ;;  %v2274_v61 = vld [vmem:[%s3867_s7] sm:$0x1]  ;;  %v2264_v62 = vld [vmem:[#allocation3] sm:$0x1] }
 0x156   : > { %v2837_v0 = vld [vmem:[%s3865_s5 + $0x1] sm:$0x1] }
 0x157   : > { %v847_v4 = vmax.f32 %v843_v3, 0.0  ;;  %954 = vrot.lane.b32.xlu1 %v845_v1, %s3186_s29  ;;  %960 = vrot.lane.b32.xlu0 %v848_v2, %s3186_s29  ;;  %v2839_v3 = vld [vmem:[%s3865_s5 + $0x2] sm:$0x1] }
 0x158   : > { %2990 = vmatprep.subr.mxu0 %v848_v2 }
 0x159   : > { %2991 = vmatpush3.msra.mxu0 %v848_v2 }
 0x15a   : > { %2992 = vmatprep.subr.mxu0 %v847_v4 }
 0x15b   : > { %2993 = vmatpush3.msra.mxu0 %v847_v4  ;;  %1058 = vrot.lane.b32.xlu0 %v848_v2, %s3189_s18 }
 0x15c   : > { %958 = vrot.lane.b32.xlu1 %v847_v4, %s3186_s29  ;;  %2994 = vmatprep.subr.mxu0 %v846_v57 }
 0x15d   : > { %2995 = vmatpush3.msra.mxu0 %v846_v57 }
 0x15e   : > { %2996 = vmatprep.subr.mxu0 %v845_v1 }
 0x15f   : > { %2997 = vmatpush3.msra.mxu0 %v845_v1  ;;  %1156 = vrot.lane.b32.xlu0 %v848_v2, %s3187_s30 }
 0x160   : > { %1056 = vrot.lane.b32.xlu1 %v847_v4, %s3189_s18  ;;  %2999 = vmatmul.mubr.msk.f32.vlgmr.msra.gmra.mxu0 %vm863_vm1, %v862_v5 }
 0x161   : > { %3020 = vmatprep.mubr.msk.f32.mxu0 %vm863_vm1, %v2825_v6  ;;  %v2841_v6 = vld [vmem:[%s3865_s5 + $0x3] sm:$0x1] }
 0x163   : > { %1154 = vrot.lane.b32.xlu0 %v847_v4, %s3187_s30 }
 0x164   : > { %1052 = vrot.lane.b32.xlu1 %v845_v1, %s3189_s18 }
 0x167   : > { %1152 = vrot.lane.b32.xlu0 %v846_v57, %s3187_s30  ;;  %v2862_v57 = vld [vmem:[%s3867_s7 + $0x5] sm:$0x1] }
 0x168   : > { %1150 = vrot.lane.b32.xlu1 %v845_v1, %s3187_s30  ;;  %s3193_s30 = smov 118  }
 0x16b   : > { %853 = vperm.xlu0 %3165, %v849_v7  }
 0x16c   : > { %858 = vperm.xlu1 %3164, %v850_v8  }
 0x1c5   : > { %v1055_v9 = vpop.permute.xlu1 %1054  ;;  %v957_v10 = vpop.permute.xlu0 %956 }
 0x1c9   : > { %v955_v11 = vpop.permute.xlu1 %954  ;;  %v961_v12 = vpop.permute.xlu0 %960 }
 0x1ca   : > { %3001 = vmatprep.subr.mxu1 %v961_v12 }
 0x1cb   : > { %3002 = vmatpush3.msra.mxu1 %v961_v12  ;;  %v2845_v12 = vld [vmem:[%s3865_s5 + $0x5] sm:$0x1] }
 0x1cd   : > { %v1059_v13 = vpop.permute.xlu0 %1058 }
 0x1ce   : > { %v959_v14 = vpop.permute.xlu1 %958  ;;  %3012 = vmatprep.subr.mxu0 %v1059_v13 }
 0x1cf   : > { %3003 = vmatprep.subr.mxu1 %v959_v14  ;;  %3013 = vmatpush3.msra.mxu0 %v1059_v13 }
 0x1d0   : > { %3004 = vmatpush3.msra.mxu1 %v959_v14 }
 0x1d1   : > { %3005 = vmatprep.subr.mxu1 %v957_v10  ;;  %v1157_v15 = vpop.permute.xlu0 %1156 }
 0x1d2   : > { %3006 = vmatpush3.msra.mxu1 %v957_v10  ;;  %v1057_v16 = vpop.permute.xlu1 %1056 }
 0x1d3   : > { %3007 = vmatprep.subr.mxu1 %v955_v11  ;;  %3014 = vmatprep.subr.mxu0 %v1057_v16 }
 0x1d4   : > { %3008 = vmatpush3.msra.mxu1 %v955_v11  ;;  %3015 = vmatpush3.msra.mxu0 %v1057_v16 }
 0x1d5   : > { %3010 = vmatmul.mubr.msk.f32.vlgmr.msra.gmra.mxu1 %vm863_vm1, %v2822_v17  ;;  %3016 = vmatprep.subr.mxu0 %v1055_v9  ;;  %v1155_v18 = vpop.permute.xlu0 %1154 }
 0x1d6   : > { %3023 = vmatprep.subr.mxu1 %v1157_v15  ;;  %v1053_v19 = vpop.permute.xlu1 %1052  ;;  %3017 = vmatpush3.msra.mxu0 %v1055_v9  ;;  %v2843_v9 = vld [vmem:[%s3865_s5 + $0x4] sm:$0x1] }
 0x1d7   : > { %3024 = vmatpush3.msra.mxu1 %v1157_v15  ;;  %3018 = vmatprep.subr.mxu0 %v1053_v19  ;;  %v2847_v15 = vld [vmem:[%s3865_s5 + $0x6] sm:$0x1] }
 0x1d8   : > { %3025 = vmatprep.subr.mxu1 %v1155_v18  ;;  %3019 = vmatpush3.msra.mxu0 %v1053_v19 }
 0x1d9   : > { %3026 = vmatpush3.msra.mxu1 %v1155_v18  ;;  %3021 = vmatmul.mubr.msk.f32.vlgmr.msra.gmra.mxu0 %vm863_vm1, %v2826_v20  ;;  %v1153_v22 = vpop.permute.xlu0 %1152  ;;  %v2849_v18 = vld [vmem:[%s3865_s5 + $0x7] sm:$0x1] }
 0x1da   : > { %3027 = vmatprep.subr.mxu1 %v1153_v22  ;;  %3031 = vmatprep.mubr.msk.f32.mxu1 %vm863_vm1, %v2829_v21  ;;  %v1151_v23 = vpop.permute.xlu1 %1150  ;;  %v2851_v21 = vld [vmem:[%s3865_s5 + $0x8] sm:$0x1] }
 0x1db   : > { %3028 = vmatpush3.msra.mxu1 %v1153_v22  ;;  %3034 = vmatprep.subr.msk.mxu0 %vm1257_vm2, %v1249_v25 }
 0x1dc   : > { %3029 = vmatprep.subr.mxu1 %v1151_v23  ;;  %3035 = vmatpush3.msk.msra.mxu0 %vm1257_vm2, %v1249_v25  ;;  %v2107_v25 = vld [vmem:[%s3869_s10 + $0xd8] sm:$0x3f] }
 0x1dd   : > { %3030 = vmatpush3.msra.mxu1 %v1151_v23  ;;  %3036 = vmatprep.subr.mxu0 %v1248_v26  ;;  %v2108_v23 = vld [vmem:[%s3869_s10 + $0xe0] sm:$0x3f] }
 0x1de   : > { %3032 = vmatmul.mubr.msk.f32.vlgmr.msra.gmra.mxu1 %vm863_vm1, %v2830_v24  ;;  %3037 = vmatpush3.msra.mxu0 %v1248_v26  ;;  %v2109_v26 = vld [vmem:[%s3869_s10 + $0xe8] sm:$0x3f] }
 0x1df   : > { %3038 = vmatprep.subr.mxu0 %v1247_v27  ;;  %3043 = vmatprep.subr.mxu1 %v3190_v48 }
 0x1e0   : > { %3039 = vmatpush3.msra.mxu0 %v1247_v27  ;;  %3047 = vmatprep.mubr.msk.f32.mxu1 %vm3191_vm4, %v3190_v48  ;;  %v2105_v27 = vld [vmem:[%s3869_s10 + $0xc8] sm:$0xff] }
 0x1e1   : > { %3057 = vmatprep.subr.mxu0 %v3190_v48 }
 0x1e6   : > { %v854_v33 = vpop.permute.xlu0 %853 }
 0x1e7   : > { %v859_v31 = vpop.permute.xlu1 %858 }
 0x220   : > { %v3000_v28 = vpop.f32.mrf.mxu0 }
 0x221   : > { %v946_v34 = vadd.f32 %v3000_v28, %v859_v31  ;;  %v2104_v28 = vld [vmem:[%s3869_s10 + $0xc0] sm:$0xff] }
 0x222   : > { %v936_v30 = vpop.f32.mrf.mxu0 }
 0x223   : > { %v945_v36 = vadd.f32 %v936_v30, %v854_v33  ;;  %v2102_v30 = vld [vmem:[%s3869_s10 + $0xb0] sm:$0xff]  ;;  %v2103_v33 = vld [vmem:[%s3869_s10 + $0xb8] sm:$0xff] }
 0x295   : > { %v3011_v29 = vpop.f32.mrf.mxu1 }
 0x296   : > { %v1048_v37 = vadd.f32 %v3011_v29, %v946_v34  ;;  %v2106_v29 = vld [vmem:[%s3869_s10 + $0xd0] sm:$0xff]  ;;  %v2099_v34 = vld [vmem:[%s3869_s10 + $0x98] sm:$0xff] }
 0x297   : > { %v1038_v35 = vpop.f32.mrf.mxu1 }
 0x298   : > { %v1047_v39 = vadd.f32 %v1038_v35, %v945_v36  ;;  %v2098_v35 = vld [vmem:[%s3869_s10 + $0x90] sm:$0xff]  ;;  %v2100_v36 = vld [vmem:[%s3869_s10 + $0xa0] sm:$0xff] }
 0x299   : > { %v3022_v32 = vpop.f32.mrf.mxu0 }
 0x29a   : > { %v1146_v40 = vadd.f32 %v3022_v32, %v1048_v37  ;;  %v2101_v32 = vld [vmem:[%s3869_s10 + $0xa8] sm:$0xff]  ;;  %v2096_v37 = vld [vmem:[%s3869_s10 + $0x80] sm:$0xff] }
 0x29b   : > { %v1136_v38 = vpop.f32.mrf.mxu0 }
 0x29c   : > { %v1145_v42 = vadd.f32 %v1136_v38, %v1047_v39  ;;  %v2095_v38 = vld [vmem:[%s3869_s10 + $0x78] sm:$0xff]  ;;  %v2097_v39 = vld [vmem:[%s3869_s10 + $0x88] sm:$0xff] }
 0x29e   : > { %v3033_v41 = vpop.f32.mrf.mxu1 }
 0x29f   : > { %v1244_v43 = vadd.f32 %v3033_v41, %v1146_v40  ;;  %v2093_v40 = vld [vmem:[%s3869_s10 + $0x68] sm:$0xff]  ;;  %v2092_v41 = vld [vmem:[%s3869_s10 + $0x60] sm:$0xff] }
 0x2a0   : > { %v1234_v44 = vpop.f32.mrf.mxu1 }
 0x2a1   : > { %v1243_v45 = vadd.f32 %v1234_v44, %v1145_v42  ;;  %v1246_v47 = vmax.f32 %v1244_v43, 0.0  ;;  %v2094_v42 = vld [vmem:[%s3869_s10 + $0x70] sm:$0xff]  ;;  %v2089_v44 = vld [vmem:[%s3869_s10 + $0x48] sm:$0xff] }
 0x2a2   : > { %v2090_v43 = vld [vmem:[%s3869_s10 + $0x50] sm:$0xff] }
 0x2a3   : > { %v1245_v46 = vmax.f32 %v1243_v45, 0.0  ;;  %v2091_v45 = vld [vmem:[%s3869_s10 + $0x58] sm:$0xff] }
 0x2a5   : > { %3040 = vmatprep.mubr.msk.f32.mxu0 %vm1250_vm3, %v1245_v46  ;;  %v2087_v46 = vld [vmem:[%s3869_s10 + $0x38] sm:$0xff] }
 0x2a6   : > { %3041 = vmatmul.mubr.msk.f32.vlgmr.msra.gmra.mxu0 %vm1250_vm3, %v1246_v47  ;;  %v2086_v47 = vld [vmem:[%s3869_s10 + $0x30] sm:$0xff] }
 0x2a7   : > { %3061 = vmatprep.mubr.msk.f32.mxu0 %vm3191_vm4, %v3190_v48 }
 0x366   : > { %v3042_v49 = vpop.f32.mrf.mxu0 }
 0x367   : > { %1428 = vrot.lane.b32.xlu0 %v3042_v49, %s3186_s29  ;;  %3044 = vmatpush3.msra.mxu1 %v3042_v49 }
 0x368   : > { %v1327_v51 = vpop.f32.mrf.mxu0  ;;  %3045 = vmatprep.subr.mxu1 %v3190_v48 }
 0x369   : > { %1426 = vrot.lane.b32.xlu1 %v1327_v51, %s3186_s29  ;;  %3046 = vmatpush3.msra.mxu1 %v1327_v51 }
 0x36a   : > { %3048 = vmatmul.mubr.msk.f32.vlgmr.msra.gmra.mxu1 %vm1347_vm5, %v1346_v50  ;;  %3050 = vmatprep.subr.mxu1 %v3190_v48  ;;  %v2084_v50 = vld [vmem:[%s3869_s10 + $0x20] sm:$0xff] }
 0x36b   : > { %1510 = vrot.lane.b32.xlu0 %v3042_v49, %s3192_s28  ;;  %3054 = vmatprep.mubr.msk.f32.mxu1 %vm3191_vm4, %v3190_v48 }
 0x36d   : > { %1508 = vrot.lane.b32.xlu1 %v1327_v51, %s3192_s28 }
 0x36f   : > { %1592 = vrot.lane.b32.xlu0 %v3042_v49, %s3193_s30 }
 0x371   : > { %1590 = vrot.lane.b32.xlu1 %v1327_v51, %s3193_s30 }
 0x373   : > { %1674 = vrot.lane.b32.xlu0 %v3042_v49, %s3194_s12 }
 0x375   : > { %1672 = vrot.lane.b32.xlu1 %v1327_v51, %s3194_s12  ;;  %s3199_s12 = smov 110  }
 0x377   : > { %1756 = vrot.lane.b32.xlu0 %v3042_v49, %s3195_s13 }
 0x379   : > { %1754 = vrot.lane.b32.xlu1 %v1327_v51, %s3195_s13 }
 0x37b   : > { %1838 = vrot.lane.b32.xlu0 %v3042_v49, %s3196_s14 }
 0x37d   : > { %1836 = vrot.lane.b32.xlu1 %v1327_v51, %s3196_s14 }
 0x37f   : > { %1920 = vrot.lane.b32.xlu0 %v3042_v49, %s3197_s15 }
 0x381   : > { %1918 = vrot.lane.b32.xlu1 %v1327_v51, %s3197_s15  ;;  %s3200_s15 = smov 109  }
 0x383   : > { %2002 = vrot.lane.b32.xlu0 %v3042_v49, %s3198_s16  ;;  %v2088_v49 = vld [vmem:[%s3869_s10 + $0x40] sm:$0xff] }
 0x385   : > { %2000 = vrot.lane.b32.xlu1 %v1327_v51, %s3198_s16  ;;  %v2083_v51 = vld [vmem:[%s3869_s10 + $0x18] sm:$0xff] }
 0x387   : > { %1339 = vperm.xlu0 %3165, %v1336_v52   ;;  %v2085_v52 = vld [vmem:[%s3869_s10 + $0x28] sm:$0xff] }
 0x389   : > { %2294 = vperm.xlu1 %3164, %v2858_v53   ;;  %v2081_v53 = vld [vmem:[%s3869_s10 + $0x8] sm:$0xff] }
 0x38b   : > { %2326 = vperm.xlu0 %3165, %v2859_v54   ;;  %v2080_v54 = vld [vmem:[%s3869_s10] sm:$0xff] }
 0x38d   : > { %2358 = vperm.xlu1 %3164, %v2860_v55   ;;  %v2082_v55 = vld [vmem:[%s3869_s10 + $0x10] sm:$0xff] }
 0x38f   : > { %2390 = vperm.xlu0 %3165, %v2861_v56   ;;  %v1342_v56 = vlaneseq }
 0x391   : > { %2422 = vperm.xlu1 %3164, %v2862_v57   ;;  %vm3724_vm15 = vcmp.lt.s32.totalorder %v1342_v56, 16  ;;  %vm3739_vm0 = vcmp.ge.s32.totalorder %v1342_v56, 16  ;;  %vm2588_vm1 = vcmp.lt.s32.totalorder %v1342_v56, 32  ;;  %vm3747_vm3 = vcmp.ge.s32.totalorder %v1342_v56, 32 }
 0x393   : > { %2454 = vperm.xlu0 %3165, %v2863_v58  }
 0x395   : > { %2486 = vperm.xlu1 %3164, %v2864_v59   ;;  %v3653_v59 = vshrl.u32 %v1342_v56, 7 }
 0x397   : > { %2518 = vperm.xlu0 %3165, %v2865_v60  }
 0x399   : > { %2277 = vperm.xlu1 %3164, %v2274_v61  }
 0x39b   : > { %2267 = vperm.xlu0 %3165, %v2264_v62   ;;  %v3656_v62 = vsub.s32 0, %v3653_v59 }
 0x3d9   : > { %v1429_v63 = vpop.permute.xlu0 %1428 }
 0x3da   : > { %3051 = vmatpush3.msra.mxu1 %v1429_v63 }
 0x3db   : > { %v1427_v1 = vpop.permute.xlu1 %1426  ;;  %3052 = vmatprep.subr.mxu1 %v3190_v48 }
 0x3dc   : > { %3053 = vmatpush3.msra.mxu1 %v1427_v1 }
 0x3dd   : > { %v1511_v2 = vpop.permute.xlu0 %1510  ;;  %3055 = vmatmul.mubr.msk.f32.vlgmr.msra.gmra.mxu1 %vm1347_vm5, %v2837_v0  ;;  %3064 = vmatprep.subr.mxu1 %v3190_v48 }
 0x3de   : > { %3058 = vmatpush3.msra.mxu0 %v1511_v2  ;;  %3068 = vmatprep.mubr.msk.f32.mxu1 %vm3191_vm4, %v3190_v48 }
 0x3df   : > { %3059 = vmatprep.subr.mxu0 %v3190_v48  ;;  %v1509_v4 = vpop.permute.xlu1 %1508 }
 0x3e0   : > { %3060 = vmatpush3.msra.mxu0 %v1509_v4 }
 0x3e1   : > { %v1593_v5 = vpop.permute.xlu0 %1592  ;;  %3062 = vmatmul.mubr.msk.f32.vlgmr.msra.gmra.mxu0 %vm1347_vm5, %v2839_v3  ;;  %3071 = vmatprep.subr.mxu0 %v3190_v48 }
 0x3e2   : > { %3065 = vmatpush3.msra.mxu1 %v1593_v5  ;;  %3075 = vmatprep.mubr.msk.f32.mxu0 %vm3191_vm4, %v3190_v48 }
 0x3e3   : > { %v1591_v7 = vpop.permute.xlu1 %1590  ;;  %3066 = vmatprep.subr.mxu1 %v3190_v48 }
 0x3e4   : > { %3067 = vmatpush3.msra.mxu1 %v1591_v7 }
 0x3e5   : > { %v1675_v8 = vpop.permute.xlu0 %1674  ;;  %3069 = vmatmul.mubr.msk.f32.vlgmr.msra.gmra.mxu1 %vm1347_vm5, %v2841_v6  ;;  %3078 = vmatprep.subr.mxu1 %v3190_v48 }
 0x3e6   : > { %3072 = vmatpush3.msra.mxu0 %v1675_v8  ;;  %3082 = vmatprep.mubr.msk.f32.mxu1 %vm3191_vm4, %v3190_v48 }
 0x3e7   : > { %3073 = vmatprep.subr.mxu0 %v3190_v48  ;;  %v1673_v10 = vpop.permute.xlu1 %1672 }
 0x3e8   : > { %3074 = vmatpush3.msra.mxu0 %v1673_v10 }
 0x3e9   : > { %v1757_v11 = vpop.permute.xlu0 %1756  ;;  %3076 = vmatmul.mubr.msk.f32.vlgmr.msra.gmra.mxu0 %vm1347_vm5, %v2843_v9  ;;  %3085 = vmatprep.subr.mxu0 %v3190_v48 }
 0x3ea   : > { %3079 = vmatpush3.msra.mxu1 %v1757_v11  ;;  %3089 = vmatprep.mubr.msk.f32.mxu0 %vm3191_vm4, %v3190_v48 }
 0x3eb   : > { %v1755_v13 = vpop.permute.xlu1 %1754  ;;  %3080 = vmatprep.subr.mxu1 %v3190_v48 }
 0x3ec   : > { %3081 = vmatpush3.msra.mxu1 %v1755_v13 }
 0x3ed   : > { %v1839_v14 = vpop.permute.xlu0 %1838  ;;  %3083 = vmatmul.mubr.msk.f32.vlgmr.msra.gmra.mxu1 %vm1347_vm5, %v2845_v12  ;;  %3092 = vmatprep.subr.mxu1 %v3190_v48 }
 0x3ee   : > { %3086 = vmatpush3.msra.mxu0 %v1839_v14  ;;  %3096 = vmatprep.mubr.msk.f32.mxu1 %vm3191_vm4, %v3190_v48 }
 0x3ef   : > { %3087 = vmatprep.subr.mxu0 %v3190_v48  ;;  %v1837_v16 = vpop.permute.xlu1 %1836 }
 0x3f0   : > { %3088 = vmatpush3.msra.mxu0 %v1837_v16 }
 0x3f1   : > { %v1921_v17 = vpop.permute.xlu0 %1920  ;;  %3090 = vmatmul.mubr.msk.f32.vlgmr.msra.gmra.mxu0 %vm1347_vm5, %v2847_v15  ;;  %3099 = vmatprep.subr.mxu0 %v3190_v48 }
 0x3f2   : > { %3093 = vmatpush3.msra.mxu1 %v1921_v17  ;;  %3103 = vmatprep.mubr.msk.f32.mxu0 %vm3191_vm4, %v3190_v48 }
 0x3f3   : > { %v1919_v19 = vpop.permute.xlu1 %1918  ;;  %3094 = vmatprep.subr.mxu1 %v3190_v48 }
 0x3f4   : > { %3095 = vmatpush3.msra.mxu1 %v1919_v19 }
 0x3f5   : > { %v2003_v20 = vpop.permute.xlu0 %2002  ;;  %3097 = vmatmul.mubr.msk.f32.vlgmr.msra.gmra.mxu1 %vm1347_vm5, %v2849_v18  ;;  %2853 = vmatprep.subr.msk.mxu1 %vm1257_vm2, %v2108_v23 }
 0x3f6   : > { %3100 = vmatpush3.msra.mxu0 %v2003_v20  ;;  %2187 = vmatprep.mubr.f32.mxu1 %v3190_v48 }
 0x3f7   : > { %3101 = vmatprep.subr.mxu0 %v3190_v48  ;;  %v2001_v22 = vpop.permute.xlu1 %2000  ;;  %2854 = vmatpush1.msk.msra.mxu1 %vm1257_vm2, %v2107_v25 }
 0x3f8   : > { %3102 = vmatpush3.msra.mxu0 %v2001_v22  ;;  %2137 = vmatprep.subr.mxu1 %v2105_v27 }
 0x3f9   : > { %3104 = vmatmul.mubr.msk.f32.vlgmr.msra.gmra.mxu0 %vm1347_vm5, %v2851_v21  ;;  %3106 = vmatprep.subr.mxu0 %v3190_v48 }
 0x3fa   : > { %3126 = vmatprep.mubr.msk.f32.mxu0 %vm3191_vm4, %v3190_v48  ;;  %3107 = vmatpush3.msk.msra.mxu0 %vm1257_vm2, %v2109_v26  ;;  %vm2589_vm2 = vmand %vm3739_vm0, %vm2588_vm1  ;;  %vm3752_vm4 = vcmp.lt.s32.totalorder %v1342_v56, 48  ;;  %vm3824_vm0 = vcmp.lt.s32.totalorder %v1342_v56, 112  ;;  %vm3829_vm1 = vcmp.ge.s32.totalorder %v1342_v56, 112 }
 0x3fb   : > { %3108 = vmatprep.subr.mxu0 %v3190_v48  ;;  %2138 = vmatpush1.msra.mxu1 %v2104_v28  ;;  %vm2596_vm5 = vmand %vm3747_vm3, %vm3752_vm4  ;;  %vm2645_vm3 = vcmask 932864  }
 0x3fc   : > { %3109 = vmatpush3.msra.mxu0 %v2106_v29  ;;  %2139 = vmatprep.subr.mxu1 %v2102_v30 }
 0x3fd   : > { %3110 = vmatprep.subr.mxu0 %v3190_v48  ;;  %2140 = vmatpush1.msra.mxu1 %v2101_v32 }
 0x3fe   : > { %3111 = vmatpush3.msra.mxu0 %v2103_v33  ;;  %2141 = vmatprep.subr.mxu1 %v2099_v34 }
 0x3ff   : > { %3112 = vmatprep.subr.mxu0 %v3190_v48  ;;  %2142 = vmatpush1.msra.mxu1 %v2098_v35 }
 0x400   : > { %3113 = vmatpush3.msra.mxu0 %v2100_v36  ;;  %2143 = vmatprep.subr.mxu1 %v2096_v37 }
 0x401   : > { %3114 = vmatprep.subr.mxu0 %v3190_v48  ;;  %2144 = vmatpush1.msra.mxu1 %v2095_v38 }
 0x402   : > { %3115 = vmatpush3.msra.mxu0 %v2097_v39  ;;  %2145 = vmatprep.subr.mxu1 %v2093_v40  ;;  %v1340_v63 = vpop.permute.xlu0 %1339 }
 0x403   : > { %3116 = vmatprep.subr.mxu0 %v3190_v48  ;;  %2146 = vmatpush1.msra.mxu1 %v2092_v41  ;;  %v1345_v2 = vrot.slane %v1340_v63, %v3656_v62 }
 0x404   : > { %3117 = vmatpush3.msra.mxu0 %v2094_v42  ;;  %2147 = vmatprep.subr.mxu1 %v2090_v43  ;;  %v2295_v21 = vpop.permute.xlu1 %2294 }
 0x405   : > { %3118 = vmatprep.subr.mxu0 %v3190_v48  ;;  %2148 = vmatpush1.msra.mxu1 %v2089_v44  ;;  %v2300_v29 = vrot.slane %v2295_v21, %v3656_v62 }
 0x406   : > { %3119 = vmatpush3.msra.mxu0 %v2091_v45  ;;  %2149 = vmatprep.subr.mxu1 %v2087_v46  ;;  %v2327_v22 = vpop.permute.xlu0 %2326 }
 0x407   : > { %3120 = vmatprep.subr.mxu0 %v3190_v48  ;;  %2150 = vmatpush1.msra.mxu1 %v2086_v47  ;;  %v2332_v36 = vrot.slane %v2327_v22, %v3656_v62 }
 0x408   : > { %3121 = vmatpush3.msra.mxu0 %v2088_v49  ;;  %2151 = vmatprep.subr.mxu1 %v2084_v50  ;;  %v2359_v23 = vpop.permute.xlu1 %2358 }
 0x409   : > { %3122 = vmatprep.subr.mxu0 %v3190_v48  ;;  %2152 = vmatpush1.msra.mxu1 %v2083_v51  ;;  %v2364_v42 = vrot.slane %v2359_v23, %v3656_v62 }
 0x40a   : > { %3123 = vmatpush3.msra.mxu0 %v2085_v52  ;;  %2153 = vmatprep.subr.mxu1 %v2081_v53 }
 0x40b   : > { %3124 = vmatprep.subr.mxu0 %v3190_v48  ;;  %2154 = vmatpush1.msra.mxu1 %v2080_v54 }
 0x40c   : > { %3125 = vmatpush3.msra.mxu0 %v2082_v55  ;;  %v2423_v25 = vpop.permute.xlu1 %2422 }
 0x410   : > { %v2487_v27 = vpop.permute.xlu1 %2486 }
 0x414   : > { %v2278_v34 = vpop.permute.xlu1 %2277 }
 0x415   : > { %v2283_v38 = vrot.slane %v2278_v34, %v3656_v62 }
 0x42a   : > { %v3552_v24 = vpop.f32.mrf.mxu1 }
 0x42b   : > { %v1421_v48 = vadd.f32 %v3552_v24, %v1345_v2  ;;  %v2391_v24 = vpop.permute.xlu0 %2390 }
 0x42c   : > { %v3049_v31 = vpop.f32.mrf.mxu1  ;;  %v2396_v53 = vrot.slane %v2391_v24, %v3656_v62 }
 0x42f   : > { %v2455_v26 = vpop.permute.xlu0 %2454 }
 0x433   : > { %v3660_v28 = vpop.permute.xlu0 %2518 }
 0x437   : > { %v2268_v37 = vpop.permute.xlu0 %2267 }
 0x438   : > { %v2273_v43 = vrot.slane %v2268_v37, %v3656_v62 }
 0x49d   : > { %v1501_v57 = vpop.f32.mrf.mxu1 }
 0x49e   : > { %v1505_v5 = vadd.f32 %v1501_v57, %v1421_v48  ;;  %v2428_v57 = vrot.slane %v2423_v25, %v3656_v62 }
 0x49f   : > { %v3056_v58 = vpop.f32.mrf.mxu1 }
 0x4a1   : > { %v1583_v60 = vpop.f32.mrf.mxu0 }
 0x4a2   : > { %v1587_v7 = vadd.f32 %v1583_v60, %v1505_v5 }
 0x4a3   : > { %v3063_v61 = vpop.f32.mrf.mxu0 }
 0x4a4   : > { %v2460_v61 = vrot.slane %v2455_v26, %v3656_v62 }
 0x4a5   : > { %v1665_v0 = vpop.f32.mrf.mxu1 }
 0x4a6   : > { %v1669_v9 = vadd.f32 %v1665_v0, %v1587_v7 }
 0x4a7   : > { %v3070_v1 = vpop.f32.mrf.mxu1 }
 0x4a8   : > { %v2492_v1 = vrot.slane %v2487_v27, %v3656_v62 }
 0x4a9   : > { %v1747_v3 = vpop.f32.mrf.mxu0 }
 0x4aa   : > { %v1751_v11 = vadd.f32 %v1747_v3, %v1669_v9  ;;  %v2524_v9 = vrot.slane %v3660_v28, %v3656_v62 }
 0x4ab   : > { %v3077_v4 = vpop.f32.mrf.mxu0 }
 0x4ad   : > { %v1829_v6 = vpop.f32.mrf.mxu1 }
 0x4ae   : > { %v1833_v13 = vadd.f32 %v1829_v6, %v1751_v11 }
 0x4af   : > { %v3084_v8 = vpop.f32.mrf.mxu1 }
 0x4b1   : > { %v1911_v10 = vpop.f32.mrf.mxu0 }
 0x4b2   : > { %v1915_v15 = vadd.f32 %v1911_v10, %v1833_v13 }
 0x4b3   : > { %v3091_v12 = vpop.f32.mrf.mxu0 }
 0x4b5   : > { %v1993_v14 = vpop.f32.mrf.mxu1 }
 0x4b6   : > { %v1997_v17 = vadd.f32 %v1993_v14, %v1915_v15 }
 0x4b7   : > { %v3098_v16 = vpop.f32.mrf.mxu1 }
 0x4b9   : > { %v2075_v18 = vpop.f32.mrf.mxu0 }
 0x4ba   : > { %v2079_v19 = vadd.f32 %v2075_v18, %v1997_v17 }
 0x4bb   : > { %v3105_v20 = vpop.f32.mrf.mxu0 }
 0x4bc   : > { %2855 = vmatmul.mubr.msk.f32.vlgmr.msra.gmra.mxu1 %vm2110_vm6, %v2079_v19  ;;  %3127 = vmatmul.mubr.msk.f32.vlgmr.msra.gmra.mxu0 %vm2110_vm6, %v2079_v19  ;;  %vm3765_vm6 = vcmp.ge.s32.totalorder %v1342_v56, 48 }
 0x57c   : > { %v3663_v30 = vpop.f32.mrf.mxu1  ;;  %v3665_v31 = vpop.f32.mrf.mxu0 }
 0x57d   : > { %v2303_v32 = vmul.f32 %v2300_v29, %v3665_v31  ;;  %v2301_v33 = vmul.f32 %v2300_v29, %v3663_v30  ;;  %v2333_v40 = vmul.f32 %v2332_v36, %v3663_v30  ;;  %v2335_v41 = vmul.f32 %v2332_v36, %v3665_v31 }
 0x57e   : > { %v3128_v35 = vpop.f32.mrf.mxu0  ;;  %v2191_v39 = vpop.f32.mrf.mxu1  ;;  %v2286_v44 = vmul.f32 %v2283_v38, %v3665_v31  ;;  %v2284_v45 = vmul.f32 %v2283_v38, %v3663_v30  ;;  %v2367_v47 = vmul.f32 %v2364_v42, %v3665_v31  ;;  %v2365_v49 = vmul.f32 %v2364_v42, %v3663_v30 }
 0x57f   : > { %2311 = vrot.lane.b32.xlu0 %v2303_v32, %s3186_s29  ;;  %2307 = vrot.lane.b32.xlu1 %v2301_v33, %s3186_s29  ;;  %v2285_v46 = vmul.f32 %v2283_v38, %v2191_v39  ;;  %v2397_v54 = vmul.f32 %v2396_v53, %v3663_v30  ;;  %v2399_v55 = vmul.f32 %v2396_v53, %v3665_v31 }
 0x580   : > { %v3683_v50 = vadd.f32 %v2286_v44, %v2273_v43  ;;  %v3685_v51 = vadd.f32 %v2284_v45, %v2273_v43  ;;  %v2431_v58 = vmul.f32 %v2428_v57, %v3665_v31  ;;  %v2429_v60 = vmul.f32 %v2428_v57, %v3663_v30 }
 0x581   : > { %v3687_v52 = vadd.f32 %v2285_v46, %v2273_v43  ;;  %v2461_v63 = vmul.f32 %v2460_v61, %v3663_v30  ;;  %v2463_v0 = vmul.f32 %v2460_v61, %v3665_v31  ;;  %v2495_v2 = vmul.f32 %v2492_v1, %v3665_v31 }
 0x582   : > { %v2493_v3 = vmul.f32 %v2492_v1, %v3663_v30  ;;  %v2334_v48 = vmul.f32 %v2332_v36, %v2191_v39  ;;  %v2302_v4 = vmul.f32 %v2300_v29, %v2191_v39  ;;  %v2398_v5 = vmul.f32 %v2396_v53, %v2191_v39 }
 0x583   : > { %2339 = vrot.lane.b32.xlu0 %v2333_v40, %s3192_s28  ;;  %2343 = vrot.lane.b32.xlu1 %v2335_v41, %s3192_s28  ;;  %v2366_v6 = vmul.f32 %v2364_v42, %v2191_v39  ;;  %v2462_v7 = vmul.f32 %v2460_v61, %v2191_v39  ;;  %v2430_v8 = vmul.f32 %v2428_v57, %v2191_v39 }
 0x584   : > { %v2526_v10 = vmul.f32 %v2524_v9, %v2191_v39  ;;  %v2494_v11 = vmul.f32 %v2492_v1, %v2191_v39  ;;  %v2525_v12 = vmul.f32 %v2524_v9, %v3663_v30  ;;  %v2527_v13 = vmul.f32 %v2524_v9, %v3665_v31 }
 0x587   : > { %2375 = vrot.lane.b32.xlu0 %v2367_v47, %s3199_s12  ;;  %2371 = vrot.lane.b32.xlu1 %v2365_v49, %s3199_s12 }
 0x58b   : > { %2403 = vrot.lane.b32.xlu0 %v2397_v54, %s3200_s15  ;;  %2407 = vrot.lane.b32.xlu1 %v2399_v55, %s3200_s15 }
 0x58f   : > { %2439 = vrot.lane.b32.xlu0 %v2431_v58, %s3196_s14  ;;  %2435 = vrot.lane.b32.xlu1 %v2429_v60, %s3196_s14 }
 0x593   : > { %2467 = vrot.lane.b32.xlu0 %v2461_v63, %s3201_s17  ;;  %2471 = vrot.lane.b32.xlu1 %v2463_v0, %s3201_s17 }
 0x597   : > { %2503 = vrot.lane.b32.xlu0 %v2495_v2, %s3202_s19  ;;  %2499 = vrot.lane.b32.xlu1 %v2493_v3, %s3202_s19 }
 0x59b   : > { %2341 = vrot.lane.b32.xlu0 %v2334_v48, %s3192_s28  ;;  %2309 = vrot.lane.b32.xlu1 %v2302_v4, %s3186_s29  ;;  %s2790_s29 = sshll.u32 %s3901_s22, 1  ;;  %s3205_s22 = smov 112  }
 0x59c   : > { %s3721_s23 = scalar_lea.vmem %s3870_s11, %s2790_s29 }
 0x59f   : > { %2405 = vrot.lane.b32.xlu0 %v2398_v5, %s3200_s15  ;;  %2373 = vrot.lane.b32.xlu1 %v2366_v6, %s3199_s12 }
 0x5a3   : > { %2469 = vrot.lane.b32.xlu0 %v2462_v7, %s3201_s17  ;;  %2437 = vrot.lane.b32.xlu1 %v2430_v8, %s3196_s14 }
 0x5a7   : > { %2533 = vrot.lane.b32.xlu0 %v2526_v10, %s3203_s20  ;;  %2501 = vrot.lane.b32.xlu1 %v2494_v11, %s3202_s19 }
 0x5ab   : > { %2531 = vrot.lane.b32.xlu0 %v2525_v12, %s3203_s20  ;;  %2535 = vrot.lane.b32.xlu1 %v2527_v13, %s3203_s20 }
 0x5f1   : > { %v2312_v14 = vpop.permute.xlu0 %2311  ;;  %v2308_v15 = vpop.permute.xlu1 %2307 }
 0x5f2   : > { %v2321_v33 = vadd.f32 %v2312_v14, %v3683_v50 }
 0x5f5   : > { %v2340_v16 = vpop.permute.xlu0 %2339  ;;  %v2344_v17 = vpop.permute.xlu1 %2343 }
 0x5f6   : > { %v2353_v40 = vadd.f32 %v2344_v17, %v2321_v33 }
 0x5f9   : > { %v2376_v18 = vpop.permute.xlu0 %2375  ;;  %v2372_v62 = vpop.permute.xlu1 %2371 }
 0x5fa   : > { %v2385_v45 = vadd.f32 %v2376_v18, %v2353_v40 }
 0x5fd   : > { %v2404_v19 = vpop.permute.xlu0 %2403  ;;  %v2408_v20 = vpop.permute.xlu1 %2407 }
 0x5fe   : > { %v2417_v53 = vadd.f32 %v2408_v20, %v2385_v45 }
 0x601   : > { %v2440_v21 = vpop.permute.xlu0 %2439  ;;  %v2436_v22 = vpop.permute.xlu1 %2435 }
 0x602   : > { %v2449_v60 = vadd.f32 %v2440_v21, %v2417_v53 }
 0x605   : > { %v2468_v23 = vpop.permute.xlu0 %2467  ;;  %v2472_v24 = vpop.permute.xlu1 %2471 }
 0x606   : > { %v2481_v48 = vadd.f32 %v2472_v24, %v2449_v60 }
 0x609   : > { %v2504_v25 = vpop.permute.xlu0 %2503  ;;  %v2500_v26 = vpop.permute.xlu1 %2499 }
 0x60a   : > { %v2513_v6 = vadd.f32 %v2504_v25, %v2481_v48 }
 0x60d   : > { %v2342_v27 = vpop.permute.xlu0 %2341  ;;  %v2310_v28 = vpop.permute.xlu1 %2309 }
 0x60e   : > { %v2314_v29 = vsel %vm2313_vm7, %v2308_v15, %v2310_v28  ;;  %v2315_v30 = vsel %vm2313_vm7, %v2310_v28, %v2312_v14  ;;  %v2346_v34 = vsel %vm2345_vm8, %v2340_v16, %v2342_v27  ;;  %v2347_v35 = vsel %vm2345_vm8, %v2342_v27, %v2344_v17 }
 0x60f   : > { %v2319_v31 = vadd.f32 %v2314_v29, %v3685_v51  ;;  %v2320_v32 = vadd.f32 %v2315_v30, %v3687_v52  ;;  %vm3770_vm7 = vcmp.lt.s32.totalorder %v1342_v56, 64 }
 0x610   : > { %vm2603_vm8 = vmand %vm3765_vm6, %vm3770_vm7 }
 0x611   : > { %v2406_v36 = vpop.permute.xlu0 %2405  ;;  %v2351_v37 = vadd.f32 %v2346_v34, %v2319_v31  ;;  %v2374_v38 = vpop.permute.xlu1 %2373  ;;  %v2352_v39 = vadd.f32 %v2347_v35, %v2320_v32 }
 0x612   : > { %v2378_v41 = vsel %vm2377_vm9, %v2372_v62, %v2374_v38  ;;  %v2379_v42 = vsel %vm2377_vm9, %v2374_v38, %v2376_v18  ;;  %v2410_v46 = vsel %vm2409_vm10, %v2404_v19, %v2406_v36  ;;  %v2411_v47 = vsel %vm2409_vm10, %v2406_v36, %v2408_v20 }
 0x613   : > { %v2383_v43 = vadd.f32 %v2378_v41, %v2351_v37  ;;  %v2384_v44 = vadd.f32 %v2379_v42, %v2352_v39  ;;  %vm3783_vm9 = vcmp.ge.s32.totalorder %v1342_v56, 64  ;;  %vm3788_vm10 = vcmp.lt.s32.totalorder %v1342_v56, 80 }
 0x615   : > { %v2470_v49 = vpop.permute.xlu0 %2469  ;;  %v2415_v51 = vadd.f32 %v2410_v46, %v2383_v43  ;;  %v2438_v50 = vpop.permute.xlu1 %2437  ;;  %v2416_v52 = vadd.f32 %v2411_v47, %v2384_v44 }
 0x616   : > { %v2442_v54 = vsel %vm2441_vm11, %v2436_v22, %v2438_v50  ;;  %v2443_v55 = vsel %vm2441_vm11, %v2438_v50, %v2440_v21  ;;  %v2474_v61 = vsel %vm2473_vm12, %v2468_v23, %v2470_v49  ;;  %v2475_v63 = vsel %vm2473_vm12, %v2470_v49, %v2472_v24 }
 0x617   : > { %v2447_v57 = vadd.f32 %v2442_v54, %v2415_v51  ;;  %v2448_v58 = vadd.f32 %v2443_v55, %v2416_v52  ;;  %v3204_v24 = vmov 1966171168   ;;  %vm3793_vm11 = vcmp.ge.s32.totalorder %v1342_v56, 80 }
 0x618   : > { %vm3798_vm12 = vcmp.lt.s32.totalorder %v1342_v56, 96 }
 0x619   : > { %v2534_v0 = vpop.permute.xlu0 %2533  ;;  %v2479_v1 = vadd.f32 %v2474_v61, %v2447_v57  ;;  %v2502_v2 = vpop.permute.xlu1 %2501  ;;  %v2480_v3 = vadd.f32 %v2475_v63, %v2448_v58 }
 0x61a   : > { %v2506_v4 = vsel %vm2505_vm13, %v2500_v26, %v2502_v2  ;;  %v2507_v5 = vsel %vm2505_vm13, %v2502_v2, %v2504_v25  ;;  %v2571_v25 = vunpack.c.l.s4 %v3204_v24  ;;  %vm2610_vm13 = vmand %vm3783_vm9, %vm3788_vm10 }
 0x61b   : > { %v2511_v7 = vadd.f32 %v2506_v4, %v2479_v1  ;;  %v2512_v8 = vadd.f32 %v2507_v5, %v2480_v3 }
 0x61c   : > { %v2572_v26 = vunpack.c.0.s8 %v2571_v25 }
 0x61d   : > { %v2532_v9 = vpop.permute.xlu0 %2531  ;;  %v2536_v10 = vpop.permute.xlu1 %2535 }
 0x61e   : > { %v2538_v11 = vsel %vm2537_vm14, %v2532_v9, %v2534_v0  ;;  %v2539_v12 = vsel %vm2537_vm14, %v2534_v0, %v2536_v10  ;;  %v2545_v13 = vadd.f32 %v2536_v10, %v2513_v6  ;;  %v2575_v27 = vsub.s32 %v2572_v26, %v3653_v59  ;;  %vm2617_vm14 = vmand %vm3793_vm11, %vm3798_vm12 }
 0x61f   : > { %v2543_v14 = vadd.f32 %v2538_v11, %v2511_v7  ;;  %v2544_v15 = vadd.f32 %v2539_v12, %v2512_v8 }
 0x620   : > { %v2868_v16 = vmul.f32 -1.442695, %v2545_v13 }
 0x621   : > { %v2866_v17 = vmul.f32 -1.442695, %v2543_v14  ;;  %v2867_v18 = vmul.f32 -1.442695, %v2544_v15 }
 0x622   : > { %3166 = vpow2.f32 %v2868_v16 }
 0x623   : > { %3168 = vpow2.f32 %v2866_v17 }
 0x624   : > { %3170 = vpow2.f32 %v2867_v18 }
 0x62f   : > { %v3167_v62 = vpop.eup %3166 }
 0x630   : > { %v3169_v19 = vpop.eup %3168  ;;  %v2557_v20 = vadd.f32 1.0, %v3167_v62 }
 0x631   : > { %v3171_v21 = vpop.eup %3170  ;;  %v2555_v22 = vadd.f32 1.0, %v3169_v19 }
 0x632   : > { %v2556_v23 = vadd.f32 1.0, %v3171_v21  ;;  %3172 = vrcp.f32 %v2557_v20 }
 0x633   : > { %3174 = vrcp.f32 %v2555_v22 }
 0x634   : > { %3176 = vrcp.f32 %v2556_v23 }
 0x63f   : > { %v3173_v29 = vpop.eup %3172 }
 0x640   : > { %v3175_v30 = vpop.eup %3174  ;;  %v2719_v31 = vrot.slane %v3173_v29, %v2575_v27 }
 0x641   : > { %v3177_v32 = vpop.eup %3176  ;;  %v2576_v33 = vrot.slane %v3175_v30, %v2575_v27  ;;  %2568 = vst.msk [vmem:[%s3721_s23] sm:$0x1] %vm3724_vm15, %v3175_v30 }
 0x642   : > { %v2658_v59 = vrot.slane %v3177_v32, %v2575_v27  ;;  %v2691_v34 = vcombine.low %v3177_v32, %v3173_v29  ;;  %v2627_v35 = vcombine.low %v3175_v30, %v3177_v32  ;;  %v2726_v36 = vrot.slane %v2719_v31, %v2575_v27 }
 0x643   : > { %v2583_v37 = vrot.slane %v2576_v33, %v2575_v27 }
 0x644   : > { %v2665_v38 = vrot.slane %v2658_v59, %v2575_v27  ;;  %v2698_v39 = vrot.slane %v2691_v34, %v2575_v27  ;;  %v2634_v40 = vrot.slane %v2627_v35, %v2575_v27 }
 0x645   : > { %2584 = vrot.lane.b32.xlu0 %v2583_v37, %s3192_s28  ;;  %s3209_s28 = smov 114  }
 0x646   : > { %2666 = vrot.lane.b32.xlu1 %v2665_v38, %s3205_s22  ;;  %v2705_v41 = vrot.slane %v2698_v39, %v2575_v27  ;;  %v2641_v42 = vrot.slane %v2634_v40, %v2575_v27 }
 0x649   : > { %2591 = vrot.lane.b32.xlu0 %v2583_v37, %s3206_s24 }
 0x64a   : > { %2670 = vrot.lane.b32.xlu1 %v2665_v38, %s3199_s12  ;;  %s3211_s12 = smov 102  }
 0x64d   : > { %2598 = vrot.lane.b32.xlu0 %v2583_v37, %s3189_s18  ;;  %s3212_s18 = smov 98  }
 0x64e   : > { %2674 = vrot.lane.b32.xlu1 %v2665_v38, %s3196_s14 }
 0x651   : > { %2612 = vrot.lane.b32.xlu0 %v2583_v37, %s3193_s30 }
 0x652   : > { %2678 = vrot.lane.b32.xlu1 %v2665_v38, %s3198_s16 }
 0x655   : > { %2706 = vrot.lane.b32.xlu0 %v2705_v41, %s3207_s25 }
 0x656   : > { %2605 = vrot.lane.b32.xlu1 %v2583_v37, %s3208_s26 }
 0x659   : > { %2642 = vrot.lane.b32.xlu0 %v2641_v42, %s3209_s28 }
 0x65a   : > { %2682 = vrot.lane.b32.xlu1 %v2665_v38, %s3210_s27 }
 0x65d   : > { %2619 = vrot.lane.b32.xlu0 %v2583_v37, %s3195_s13 }
 0x65e   : > { %2686 = vrot.lane.b32.xlu1 %v2665_v38, %s3211_s12 }
 0x662   : > { %2727 = vrot.lane.b32.xlu1 %v2726_v36, %s3212_s18 }
 0x6b7   : > { %v2585_v46 = vpop.permute.xlu0 %2584 }
 0x6b8   : > { %2590 = vst.msk [vmem:[%s3721_s23] sm:$0x1] %vm2589_vm2, %v2585_v46  ;;  %v2667_v47 = vpop.permute.xlu1 %2666 }
 0x6b9   : > { %2669 = vst.msk [vmem:[%s3721_s23 + $0x1] sm:$0x1] %vm3724_vm15, %v2667_v47  ;;  %vm3819_vm15 = vcmp.ge.s32.totalorder %v1342_v56, 96 }
 0x6ba   : > { %vm2624_vm4 = vmand %vm3819_vm15, %vm3824_vm0 }
 0x6bb   : > { %v2592_v50 = vpop.permute.xlu0 %2591 }
 0x6bc   : > { %2597 = vst.msk [vmem:[%s3721_s23] sm:$0x1] %vm2596_vm5, %v2592_v50  ;;  %v2671_v52 = vpop.permute.xlu1 %2670 }
 0x6bd   : > { %2673 = vst.msk [vmem:[%s3721_s23 + $0x1] sm:$0x1] %vm2589_vm2, %v2671_v52  ;;  %vm3834_vm2 = vcmp.lt.s32.totalorder %v1342_v56, 128 }
 0x6be   : > { %vm2650_vm6 = vmand %vm3829_vm1, %vm3834_vm2 }
 0x6bf   : > { %v2599_v53 = vpop.permute.xlu0 %2598 }
 0x6c0   : > { %2604 = vst.msk [vmem:[%s3721_s23] sm:$0x1] %vm2603_vm8, %v2599_v53  ;;  %v2675_v54 = vpop.permute.xlu1 %2674 }
 0x6c1   : > { %2677 = vst.msk [vmem:[%s3721_s23 + $0x1] sm:$0x1] %vm2596_vm5, %v2675_v54  ;;  %vm2709_vm5 = vcmask 818176  }
 0x6c3   : > { %v2613_v55 = vpop.permute.xlu0 %2612 }
 0x6c4   : > { %v2679_v60 = vpop.permute.xlu1 %2678 }
 0x6c5   : > { %2681 = vst.msk [vmem:[%s3721_s23 + $0x1] sm:$0x1] %vm2603_vm8, %v2679_v60 }
 0x6c7   : > { %v2707_v0 = vpop.permute.xlu0 %2706 }
 0x6c8   : > { %v2606_v1 = vpop.permute.xlu1 %2605  ;;  %v2708_v8 = vrot.slane %v2707_v0, 1 }
 0x6c9   : > { %2611 = vst.msk [vmem:[%s3721_s23] sm:$0x1] %vm2610_vm13, %v2606_v1 }
 0x6ca   : > { %2618 = vst.msk [vmem:[%s3721_s23] sm:$0x1] %vm2617_vm14, %v2613_v55  ;;  %v2710_v11 = vsel %vm2709_vm5, %v2707_v0, %v2708_v8 }
 0x6cb   : > { %v2643_v48 = vpop.permute.xlu0 %2642 }
 0x6cc   : > { %v2683_v6 = vpop.permute.xlu1 %2682  ;;  %v2644_v7 = vrot.slane %v2643_v48, 1 }
 0x6cd   : > { %2685 = vst.msk [vmem:[%s3721_s23 + $0x1] sm:$0x1] %vm2610_vm13, %v2683_v6 }
 0x6ce   : > { %v2646_v9 = vsel %vm2645_vm3, %v2643_v48, %v2644_v7 }
 0x6cf   : > { %v2620_v56 = vpop.permute.xlu0 %2619 }
 0x6d0   : > { %v2687_v10 = vpop.permute.xlu1 %2686  ;;  %2625 = vst.msk [vmem:[%s3721_s23] sm:$0x1] %vm2624_vm4, %v2620_v56 }
 0x6d1   : > { %2689 = vst.msk [vmem:[%s3721_s23 + $0x1] sm:$0x1] %vm2617_vm14, %v2687_v10 }
 0x6d2   : > { %2651 = vst.msk [vmem:[%s3721_s23] sm:$0x1] %vm2650_vm6, %v2646_v9 }
 0x6d3   : > { %2712 = vst.msk [vmem:[%s3721_s23 + $0x1] sm:$0x1] %vm2624_vm4, %v2710_v11 }
 0x6d4   : > { %v2728_v12 = vpop.permute.xlu1 %2727 }
 0x6d5   : > { %2730 = vst.msk [vmem:[%s3721_s23 + $0x1] sm:$0x1] %vm2650_vm6, %v2728_v12 }
 0x6d6 PF: > { %s25_s21 = sadd.s32 1, %s3184_s21  }
 0x6d7   : > { %p22_p4 = scmp.ge.s32.totalorder %s25_s21, 4  }
 0x6d9   :  { %24 = sbr.rel (!%p22_p4) target bundleno = 3 (0x3), region = 116 }

</bundles_post_ra>
